<compile_context>
chip_gen: v7x
topology: tpu7x:2x2x1
jax: 0.10.0
libtpu: 0.0.40
codegen_flags: <defaults>
</compile_context>

<pallas_src>
import jax
import jax.numpy as jnp
from jax.experimental import pallas as pl
from jax.experimental.pallas import tpu as pltpu


def _make_kernel(num_layers, chunk_steps, B, E, H, compute_dtype):
    """Kernel over one chunk of `chunk_steps` timesteps.

    Ref order: x_flat_chunk, h0, c0, (W_ih, W_hh, b) * num_layers,
               out_chunk, h_next, c_next, x0g_scratch
    h_next / c_next use constant output index maps (resident accumulators) and
    double as the cross-chunk recurrent carry.
    """
    L = num_layers
    CT = chunk_steps

    def kernel(*refs):
        x_ref, h0_ref, c0_ref = refs[0], refs[1], refs[2]
        idx = 3
        layer_refs = []
        for _ in range(L):
            layer_refs.append((refs[idx], refs[idx + 1], refs[idx + 2]))
            idx += 3
        out_ref, hN_ref, cN_ref = refs[idx], refs[idx + 1], refs[idx + 2]
        x0g_ref = refs[idx + 3]  # VMEM scratch: (CT*B, 4H) f32

        chunk = pl.program_id(0)

        @pl.when(chunk == 0)
        def _init():
            hN_ref[...] = h0_ref[...]
            cN_ref[...] = c0_ref[...]

        # ---- one big GEMM for the layer-0 input projection of the whole
        #      chunk (M = CT*B instead of M = B per step), bias folded in.
        w_ih0, _, b0 = layer_refs[0]
        x0g_ref[...] = (
            jnp.dot(x_ref[...], w_ih0[...], preferred_element_type=jnp.float32)
            + b0[...]
        )

        # ---- read the recurrent state ONCE per chunk; carry it in registers.
        #      h in bf16 (MXU operand), c in f32 (accumulation accuracy).
        hs = [hN_ref[l].astype(compute_dtype) for l in range(L)]
        cs = [cN_ref[l] for l in range(L)]

        def one_step(row, t, hs, cs):
            """row = t*B offset into the precomputed layer-0 gate buffer."""
            new_hs, new_cs = [], []
            x_in = None
            top_h = None
            for l in range(L):
                w_ih_l, w_hh_l, b_l = layer_refs[l]
                if l == 0:
                    gates = x0g_ref[pl.ds(row, B), :] + jnp.dot(
                        hs[0], w_hh_l[...], preferred_element_type=jnp.float32)
                else:
                    gates = (
                        jnp.dot(x_in, w_ih_l[...],
                                preferred_element_type=jnp.float32)
                        + jnp.dot(hs[l], w_hh_l[...],
                                  preferred_element_type=jnp.float32)
                        + b_l[...]                       # (1,4H) sublane bcast
                    )
                # Gate columns were reordered at wrapper time to (i, f, o | g):
                sg = jax.nn.sigmoid(gates[:, 0:3 * H])   # one EUP call (i,f,o)
                g_g = jnp.tanh(gates[:, 3 * H:4 * H])    # one EUP call (g)
                i_g = sg[:, 0 * H:1 * H]
                f_g = sg[:, 1 * H:2 * H]
                o_g = sg[:, 2 * H:3 * H]
                c_new = f_g * cs[l] + i_g * g_g          # f32
                h_f32 = o_g * jnp.tanh(c_new)            # f32
                x_in = h_f32.astype(compute_dtype)       # bf16 carry / next input
                new_hs.append(x_in)
                new_cs.append(c_new)
                top_h = h_f32
                # inter-layer dropout: eval-mode identity
            out_ref[t] = top_h                           # top-layer output (f32)
            return new_hs, new_cs

        if CT <= 8:
            # very short chunk: straight-line code, static slices everywhere
            for t in range(CT):
                hs, cs = one_step(t * B, t, hs, cs)
        else:
            def body(t, carry):
                hs_c, cs_c = carry
                row = pl.multiple_of(t * B, B)
                hs_n, cs_n = one_step(row, t, list(hs_c), list(cs_c))
                return (tuple(hs_n), tuple(cs_n))
            hs, cs = jax.lax.fori_loop(0, CT, body,
                                       (tuple(hs), tuple(cs)), unroll=2)
            hs, cs = list(hs), list(cs)

        # ---- write the recurrent state back ONCE per chunk
        for l in range(L):
            hN_ref[l] = hs[l].astype(jnp.float32)
            cN_ref[l] = cs[l]

    return kernel


def _reorder_gates(a):
    """Reorder the 4H gate axis from PyTorch (i, f, g, o) to (i, f, o, g)
    so the kernel can apply sigmoid once to the first 3H columns."""
    i, f, g, o = jnp.split(a, 4, axis=-1)
    return jnp.concatenate([i, f, o, g], axis=-1)


def stacked_lstm_forward(x_seq, h0, c0, params, *,
                         compute_dtype=jnp.bfloat16, chunk_steps=None):
    """Run the stacked LSTM cell over a (T, B, E) input sequence.

    params: list of (W_ih:(in,4H), W_hh:(H,4H), b:(1,4H)) per layer
            (b = b_ih + b_hh folded), x @ W convention, gate order i,f,g,o.
    Returns (out_seq:(T,B,H), (h_next:(L,B,H), c_next:(L,B,H))).
    """
    T, B, E = x_seq.shape
    L, _, H = h0.shape

    CT = T if chunk_steps is None else chunk_steps
    assert T % CT == 0, "chunk_steps must divide T"
    num_chunks = T // CT

    # Flatten (T,B,E) -> (T*B,E) in the wrapper (cheap XLA op) so the kernel's
    # layer-0 chunk projection is a plain 2-D GEMM with no in-kernel reshape.
    x_flat = x_seq.reshape(T * B, E).astype(compute_dtype)

    args = [x_flat, h0.astype(jnp.float32), c0.astype(jnp.float32)]
    in_specs = [
        pl.BlockSpec((CT * B, E), lambda c: (c, 0)),     # x chunk (flattened)
        pl.BlockSpec((L, B, H), lambda c: (0, 0, 0)),    # h0 (constant)
        pl.BlockSpec((L, B, H), lambda c: (0, 0, 0)),    # c0 (constant)
    ]
    for (w_ih, w_hh, b) in params:
        w_ih_r = _reorder_gates(w_ih).astype(compute_dtype)
        w_hh_r = _reorder_gates(w_hh).astype(compute_dtype)
        b_r = _reorder_gates(b).astype(jnp.float32)
        args += [w_ih_r, w_hh_r, b_r]
        in_specs += [
            pl.BlockSpec(w_ih_r.shape, lambda c: (0, 0)),
            pl.BlockSpec(w_hh_r.shape, lambda c: (0, 0)),
            pl.BlockSpec(b_r.shape, lambda c: (0, 0)),
        ]

    out_shape = (
        jax.ShapeDtypeStruct((T, B, H), jnp.float32),    # per-step outputs
        jax.ShapeDtypeStruct((L, B, H), jnp.float32),    # h_next
        jax.ShapeDtypeStruct((L, B, H), jnp.float32),    # c_next
    )
    out_specs = (
        pl.BlockSpec((CT, B, H), lambda c: (c, 0, 0)),
        pl.BlockSpec((L, B, H), lambda c: (0, 0, 0)),    # resident carry
        pl.BlockSpec((L, B, H), lambda c: (0, 0, 0)),    # resident carry
    )

    kernel = _make_kernel(L, CT, B, E, H, compute_dtype)

    out_seq, h_n, c_n = pl.pallas_call(
        kernel,
        out_shape=out_shape,
        grid_spec=pltpu.PrefetchScalarGridSpec(
            num_scalar_prefetch=0,
            grid=(num_chunks,),
            in_specs=in_specs,
            out_specs=out_specs,
            scratch_shapes=[pltpu.VMEM((CT * B, 4 * H), jnp.float32)],
        ),
        compiler_params=pltpu.CompilerParams(
            dimension_semantics=("arbitrary",),   # recurrent carry over chunks
        ),
    )(*args)
    return out_seq, (h_n, c_n)


def stacked_lstm_reference(x_seq, h0, c0, params):
    """Pure-JAX f32 reference mirroring PyTorch StackedLSTMCell (eval dropout),
    using the ORIGINAL (i,f,g,o) gate order / unmodified params."""
    T = x_seq.shape[0]
    H = h0.shape[-1]
    h, c = h0, c0
    outs = []
    for t in range(T):
        x = x_seq[t]
        hs, cs = [], []
        for l, (w_ih, w_hh, b) in enumerate(params):
            gates = x @ w_ih + h[l] @ w_hh + b
            i_g = jax.nn.sigmoid(gates[:, 0 * H:1 * H])
            f_g = jax.nn.sigmoid(gates[:, 1 * H:2 * H])
            g_g = jnp.tanh(gates[:, 2 * H:3 * H])
            o_g = jax.nn.sigmoid(gates[:, 3 * H:4 * H])
            c_new = f_g * c[l] + i_g * g_g
            h_new = o_g * jnp.tanh(c_new)
            hs.append(h_new)
            cs.append(c_new)
            x = h_new  # eval-mode dropout
        h, c = jnp.stack(hs), jnp.stack(cs)
        outs.append(x)
    return jnp.stack(outs), (h, c)


if __name__ == "__main__":
    # small shapes consistent with the module (B a multiple of 8 per review)
    T, B = 8, 8        # sequence length, batch
    E, H = 16, 32      # input_size, hidden_size
    L = 2              # num_layers

    key = jax.random.PRNGKey(0)
    ks = jax.random.split(key, 3 + 3 * L)

    x_seq = jax.random.normal(ks[0], (T, B, E), dtype=jnp.float32)
    h0 = jax.random.normal(ks[1], (L, B, H), dtype=jnp.float32) * 0.1
    c0 = jax.random.normal(ks[2], (L, B, H), dtype=jnp.float32) * 0.1

    bound = 1.0 / (H ** 0.5)
    params = []
    for l in range(L):
        in_dim = E if l == 0 else H
        k_ih, k_hh, k_b = ks[3 + 3 * l], ks[4 + 3 * l], ks[5 + 3 * l]
        w_ih = jax.random.uniform(k_ih, (in_dim, 4 * H), jnp.float32, -bound, bound)
        w_hh = jax.random.uniform(k_hh, (H, 4 * H), jnp.float32, -bound, bound)
        b = jax.random.uniform(k_b, (1, 4 * H), jnp.float32, -bound, bound)  # b_ih+b_hh
        params.append((w_ih, w_hh, b))

    out_seq, (h_n, c_n) = stacked_lstm_forward(x_seq, h0, c0, params)
    out_seq = jax.block_until_ready(out_seq)

    ref_out, (ref_h, ref_c) = stacked_lstm_reference(x_seq, h0, c0, params)

    # bf16 matmuls + bf16 h carry vs f32 reference -> modest tolerance
    assert jnp.allclose(out_seq, ref_out, rtol=3e-2, atol=3e-2), (
        float(jnp.max(jnp.abs(out_seq - ref_out))))
    assert jnp.allclose(h_n, ref_h, rtol=3e-2, atol=3e-2)
    assert jnp.allclose(c_n, ref_c, rtol=3e-2, atol=3e-2)

    print("KERNEL_OK")
</pallas_src>

<mosaic_0001>
module attributes {stable_mosaic.version = 11 : i64} {
  func.func @kernel(%arg0: i32, %arg1: memref<64x16xbf16, #tpu.memory_space<vmem>>, %arg2: memref<2x8x32xf32, #tpu.memory_space<vmem>>, %arg3: memref<2x8x32xf32, #tpu.memory_space<vmem>>, %arg4: memref<16x128xbf16, #tpu.memory_space<vmem>>, %arg5: memref<32x128xbf16, #tpu.memory_space<vmem>>, %arg6: memref<1x128xf32, #tpu.memory_space<vmem>>, %arg7: memref<32x128xbf16, #tpu.memory_space<vmem>>, %arg8: memref<32x128xbf16, #tpu.memory_space<vmem>>, %arg9: memref<1x128xf32, #tpu.memory_space<vmem>>, %arg10: memref<8x8x32xf32, #tpu.memory_space<vmem>>, %arg11: memref<2x8x32xf32, #tpu.memory_space<vmem>>, %arg12: memref<2x8x32xf32, #tpu.memory_space<vmem>>, %arg13: memref<64x128xf32, #tpu.memory_space<vmem>>) attributes {dimension_semantics = [#tpu.dimension_semantics<arbitrary>], iteration_bounds = array<i64: 1>, scalar_prefetch = 0 : i64, scratch_operands = 1 : i64, tpu.core_type = #tpu.core_type<tc>, window_params = [{transform_indices = @transform_0, window_bounds = array<i64: 64, 16>}, {pipeline_mode = #tpu.pipeline_mode<synchronous>, transform_indices = @transform_1, window_bounds = array<i64: 2, 8, 32>}, {pipeline_mode = #tpu.pipeline_mode<synchronous>, transform_indices = @transform_2, window_bounds = array<i64: 2, 8, 32>}, {pipeline_mode = #tpu.pipeline_mode<synchronous>, transform_indices = @transform_3, window_bounds = array<i64: 16, 128>}, {pipeline_mode = #tpu.pipeline_mode<synchronous>, transform_indices = @transform_4, window_bounds = array<i64: 32, 128>}, {pipeline_mode = #tpu.pipeline_mode<synchronous>, transform_indices = @transform_5, window_bounds = array<i64: 1, 128>}, {pipeline_mode = #tpu.pipeline_mode<synchronous>, transform_indices = @transform_6, window_bounds = array<i64: 32, 128>}, {pipeline_mode = #tpu.pipeline_mode<synchronous>, transform_indices = @transform_7, window_bounds = array<i64: 32, 128>}, {pipeline_mode = #tpu.pipeline_mode<synchronous>, transform_indices = @transform_8, window_bounds = array<i64: 1, 128>}, {transform_indices = @transform_9, window_bounds = array<i64: 8, 8, 32>}, {pipeline_mode = #tpu.pipeline_mode<synchronous>, transform_indices = @transform_10, window_bounds = array<i64: 2, 8, 32>}, {pipeline_mode = #tpu.pipeline_mode<synchronous>, transform_indices = @transform_11, window_bounds = array<i64: 2, 8, 32>}]} {
    %c0_i32 = arith.constant 0 : i32
    %0 = arith.cmpi eq, %arg0, %c0_i32 : i32
    %1 = arith.extui %0 : i1 to i32
    %c0_i32_0 = arith.constant 0 : i32
    %2 = arith.cmpi ne, %1, %c0_i32_0 : i32
    scf.if %2 {
      %c0_162 = arith.constant 0 : index
      %c0_163 = arith.constant 0 : index
      %c0_164 = arith.constant 0 : index
      %426 = vector.load %arg2[%c0_162, %c0_163, %c0_164] : memref<2x8x32xf32, #tpu.memory_space<vmem>>, vector<2x8x32xf32>
      %c0_165 = arith.constant 0 : index
      %c0_166 = arith.constant 0 : index
      %c0_167 = arith.constant 0 : index
      %427 = vector.load %arg11[%c0_165, %c0_166, %c0_167] : memref<2x8x32xf32, #tpu.memory_space<vmem>>, vector<2x8x32xf32>
      tpu.vector_store %arg11[%c0_165, %c0_166, %c0_167], %426 {strides = array<i32>} : memref<2x8x32xf32, #tpu.memory_space<vmem>>, vector<2x8x32xf32>,
      %c0_168 = arith.constant 0 : index
      %c0_169 = arith.constant 0 : index
      %c0_170 = arith.constant 0 : index
      %428 = vector.load %arg3[%c0_168, %c0_169, %c0_170] : memref<2x8x32xf32, #tpu.memory_space<vmem>>, vector<2x8x32xf32>
      %c0_171 = arith.constant 0 : index
      %c0_172 = arith.constant 0 : index
      %c0_173 = arith.constant 0 : index
      %429 = vector.load %arg12[%c0_171, %c0_172, %c0_173] : memref<2x8x32xf32, #tpu.memory_space<vmem>>, vector<2x8x32xf32>
      tpu.vector_store %arg12[%c0_171, %c0_172, %c0_173], %428 {strides = array<i32>} : memref<2x8x32xf32, #tpu.memory_space<vmem>>, vector<2x8x32xf32>,
    } else {
    }
    %c0 = arith.constant 0 : index
    %c0_1 = arith.constant 0 : index
    %3 = vector.load %arg1[%c0, %c0_1] : memref<64x16xbf16, #tpu.memory_space<vmem>>, vector<64x16xbf16>
    %c0_2 = arith.constant 0 : index
    %c0_3 = arith.constant 0 : index
    %4 = vector.load %arg4[%c0_2, %c0_3] : memref<16x128xbf16, #tpu.memory_space<vmem>>, vector<16x128xbf16>
    %cst = arith.constant dense<0.000000e+00> : vector<64x128xf32>
    %5 = tpu.matmul %3, %4, %cst {dimension_numbers = #tpu.dot_dimension_numbers<[1], [0], [0], [1], [0, 0, 1, 1], [], []>} : vector<64x16xbf16>, vector<16x128xbf16>, vector<64x128xf32> -> vector<64x128xf32>
    %c0_4 = arith.constant 0 : index
    %c0_5 = arith.constant 0 : index
    %6 = vector.load %arg6[%c0_4, %c0_5] : memref<1x128xf32, #tpu.memory_space<vmem>>, vector<1x128xf32>
    %7 = vector.broadcast %6 : vector<1x128xf32> to vector<64x128xf32>
    %8 = arith.addf %5, %7 : vector<64x128xf32>
    %c0_6 = arith.constant 0 : index
    %c0_7 = arith.constant 0 : index
    %9 = vector.load %arg13[%c0_6, %c0_7] : memref<64x128xf32, #tpu.memory_space<vmem>>, vector<64x128xf32>
    tpu.vector_store %arg13[%c0_6, %c0_7], %8 {strides = array<i32>} : memref<64x128xf32, #tpu.memory_space<vmem>>, vector<64x128xf32>,
    %c0_8 = arith.constant 0 : index
    %c0_9 = arith.constant 0 : index
    %c0_10 = arith.constant 0 : index
    %10 = vector.load %arg11[%c0_8, %c0_9, %c0_10] : memref<2x8x32xf32, #tpu.memory_space<vmem>>, vector<1x8x32xf32>
    %11 = vector.shape_cast %10 : vector<1x8x32xf32> to vector<8x32xf32>
    %12 = arith.truncf %11 : vector<8x32xf32> to vector<8x32xbf16>
    %c1 = arith.constant 1 : index
    %c0_11 = arith.constant 0 : index
    %c0_12 = arith.constant 0 : index
    %13 = vector.load %arg11[%c1, %c0_11, %c0_12] : memref<2x8x32xf32, #tpu.memory_space<vmem>>, vector<1x8x32xf32>
    %14 = vector.shape_cast %13 : vector<1x8x32xf32> to vector<8x32xf32>
    %15 = arith.truncf %14 : vector<8x32xf32> to vector<8x32xbf16>
    %c0_13 = arith.constant 0 : index
    %c0_14 = arith.constant 0 : index
    %c0_15 = arith.constant 0 : index
    %16 = vector.load %arg12[%c0_13, %c0_14, %c0_15] : memref<2x8x32xf32, #tpu.memory_space<vmem>>, vector<1x8x32xf32>
    %17 = vector.shape_cast %16 : vector<1x8x32xf32> to vector<8x32xf32>
    %c1_16 = arith.constant 1 : index
    %c0_17 = arith.constant 0 : index
    %c0_18 = arith.constant 0 : index
    %18 = vector.load %arg12[%c1_16, %c0_17, %c0_18] : memref<2x8x32xf32, #tpu.memory_space<vmem>>, vector<1x8x32xf32>
    %19 = vector.shape_cast %18 : vector<1x8x32xf32> to vector<8x32xf32>
    %c0_19 = arith.constant 0 : index
    %c0_20 = arith.constant 0 : index
    %20 = vector.load %arg13[%c0_19, %c0_20] : memref<64x128xf32, #tpu.memory_space<vmem>>, vector<8x128xf32>
    %c0_21 = arith.constant 0 : index
    %c0_22 = arith.constant 0 : index
    %21 = vector.load %arg5[%c0_21, %c0_22] : memref<32x128xbf16, #tpu.memory_space<vmem>>, vector<32x128xbf16>
    %cst_23 = arith.constant dense<0.000000e+00> : vector<8x128xf32>
    %22 = tpu.matmul %12, %21, %cst_23 {dimension_numbers = #tpu.dot_dimension_numbers<[1], [0], [0], [1], [0, 0, 1, 1], [], []>} : vector<8x32xbf16>, vector<32x128xbf16>, vector<8x128xf32> -> vector<8x128xf32>
    %23 = arith.addf %20, %22 : vector<8x128xf32>
    %24 = vector.extract_strided_slice %23 {offsets = [0, 0], sizes = [8, 96], strides = [1, 1]} : vector<8x128xf32> to vector<8x96xf32>
    %25 = arith.negf %24 : vector<8x96xf32>
    %26 = math.exp %25 : vector<8x96xf32>
    %cst_24 = arith.constant 1.000000e+00 : f32
    %27 = vector.broadcast %cst_24 : f32 to vector<8x96xf32>
    %28 = arith.addf %27, %26 : vector<8x96xf32>
    %29 = arith.divf %27, %28 : vector<8x96xf32>
    %30 = vector.extract_strided_slice %23 {offsets = [0, 96], sizes = [8, 32], strides = [1, 1]} : vector<8x128xf32> to vector<8x32xf32>
    %31 = math.tanh %30 : vector<8x32xf32>
    %32 = vector.extract_strided_slice %29 {offsets = [0, 0], sizes = [8, 32], strides = [1, 1]} : vector<8x96xf32> to vector<8x32xf32>
    %33 = vector.extract_strided_slice %29 {offsets = [0, 32], sizes = [8, 32], strides = [1, 1]} : vector<8x96xf32> to vector<8x32xf32>
    %34 = vector.extract_strided_slice %29 {offsets = [0, 64], sizes = [8, 32], strides = [1, 1]} : vector<8x96xf32> to vector<8x32xf32>
    %35 = arith.mulf %33, %17 : vector<8x32xf32>
    %36 = arith.mulf %32, %31 : vector<8x32xf32>
    %37 = arith.addf %35, %36 : vector<8x32xf32>
    %38 = math.tanh %37 : vector<8x32xf32>
    %39 = arith.mulf %34, %38 : vector<8x32xf32>
    %40 = arith.truncf %39 : vector<8x32xf32> to vector<8x32xbf16>
    %c0_25 = arith.constant 0 : index
    %c0_26 = arith.constant 0 : index
    %41 = vector.load %arg7[%c0_25, %c0_26] : memref<32x128xbf16, #tpu.memory_space<vmem>>, vector<32x128xbf16>
    %cst_27 = arith.constant dense<0.000000e+00> : vector<8x128xf32>
    %42 = tpu.matmul %40, %41, %cst_27 {dimension_numbers = #tpu.dot_dimension_numbers<[1], [0], [0], [1], [0, 0, 1, 1], [], []>} : vector<8x32xbf16>, vector<32x128xbf16>, vector<8x128xf32> -> vector<8x128xf32>
    %c0_28 = arith.constant 0 : index
    %c0_29 = arith.constant 0 : index
    %43 = vector.load %arg8[%c0_28, %c0_29] : memref<32x128xbf16, #tpu.memory_space<vmem>>, vector<32x128xbf16>
    %cst_30 = arith.constant dense<0.000000e+00> : vector<8x128xf32>
    %44 = tpu.matmul %15, %43, %cst_30 {dimension_numbers = #tpu.dot_dimension_numbers<[1], [0], [0], [1], [0, 0, 1, 1], [], []>} : vector<8x32xbf16>, vector<32x128xbf16>, vector<8x128xf32> -> vector<8x128xf32>
    %45 = arith.addf %42, %44 : vector<8x128xf32>
    %c0_31 = arith.constant 0 : index
    %c0_32 = arith.constant 0 : index
    %46 = vector.load %arg9[%c0_31, %c0_32] : memref<1x128xf32, #tpu.memory_space<vmem>>, vector<1x128xf32>
    %47 = vector.broadcast %46 : vector<1x128xf32> to vector<8x128xf32>
    %48 = arith.addf %45, %47 : vector<8x128xf32>
    %49 = vector.extract_strided_slice %48 {offsets = [0, 0], sizes = [8, 96], strides = [1, 1]} : vector<8x128xf32> to vector<8x96xf32>
    %50 = arith.negf %49 : vector<8x96xf32>
    %51 = math.exp %50 : vector<8x96xf32>
    %cst_33 = arith.constant 1.000000e+00 : f32
    %52 = vector.broadcast %cst_33 : f32 to vector<8x96xf32>
    %53 = arith.addf %52, %51 : vector<8x96xf32>
    %54 = arith.divf %52, %53 : vector<8x96xf32>
    %55 = vector.extract_strided_slice %48 {offsets = [0, 96], sizes = [8, 32], strides = [1, 1]} : vector<8x128xf32> to vector<8x32xf32>
    %56 = math.tanh %55 : vector<8x32xf32>
    %57 = vector.extract_strided_slice %54 {offsets = [0, 0], sizes = [8, 32], strides = [1, 1]} : vector<8x96xf32> to vector<8x32xf32>
    %58 = vector.extract_strided_slice %54 {offsets = [0, 32], sizes = [8, 32], strides = [1, 1]} : vector<8x96xf32> to vector<8x32xf32>
    %59 = vector.extract_strided_slice %54 {offsets = [0, 64], sizes = [8, 32], strides = [1, 1]} : vector<8x96xf32> to vector<8x32xf32>
    %60 = arith.mulf %58, %19 : vector<8x32xf32>
    %61 = arith.mulf %57, %56 : vector<8x32xf32>
    %62 = arith.addf %60, %61 : vector<8x32xf32>
    %63 = math.tanh %62 : vector<8x32xf32>
    %64 = arith.mulf %59, %63 : vector<8x32xf32>
    %65 = arith.truncf %64 : vector<8x32xf32> to vector<8x32xbf16>
    %c0_34 = arith.constant 0 : index
    %c0_35 = arith.constant 0 : index
    %c0_36 = arith.constant 0 : index
    %66 = vector.load %arg10[%c0_34, %c0_35, %c0_36] : memref<8x8x32xf32, #tpu.memory_space<vmem>>, vector<1x8x32xf32>
    %67 = vector.shape_cast %66 : vector<1x8x32xf32> to vector<8x32xf32>
    %68 = vector.shape_cast %64 : vector<8x32xf32> to vector<1x8x32xf32>
    tpu.vector_store %arg10[%c0_34, %c0_35, %c0_36], %68 {strides = array<i32>} : memref<8x8x32xf32, #tpu.memory_space<vmem>>, vector<1x8x32xf32>,
    %c8 = arith.constant 8 : index
    %c0_37 = arith.constant 0 : index
    %69 = vector.load %arg13[%c8, %c0_37] : memref<64x128xf32, #tpu.memory_space<vmem>>, vector<8x128xf32>
    %c0_38 = arith.constant 0 : index
    %c0_39 = arith.constant 0 : index
    %70 = vector.load %arg5[%c0_38, %c0_39] : memref<32x128xbf16, #tpu.memory_space<vmem>>, vector<32x128xbf16>
    %cst_40 = arith.constant dense<0.000000e+00> : vector<8x128xf32>
    %71 = tpu.matmul %40, %70, %cst_40 {dimension_numbers = #tpu.dot_dimension_numbers<[1], [0], [0], [1], [0, 0, 1, 1], [], []>} : vector<8x32xbf16>, vector<32x128xbf16>, vector<8x128xf32> -> vector<8x128xf32>
    %72 = arith.addf %69, %71 : vector<8x128xf32>
    %73 = vector.extract_strided_slice %72 {offsets = [0, 0], sizes = [8, 96], strides = [1, 1]} : vector<8x128xf32> to vector<8x96xf32>
    %74 = arith.negf %73 : vector<8x96xf32>
    %75 = math.exp %74 : vector<8x96xf32>
    %cst_41 = arith.constant 1.000000e+00 : f32
    %76 = vector.broadcast %cst_41 : f32 to vector<8x96xf32>
    %77 = arith.addf %76, %75 : vector<8x96xf32>
    %78 = arith.divf %76, %77 : vector<8x96xf32>
    %79 = vector.extract_strided_slice %72 {offsets = [0, 96], sizes = [8, 32], strides = [1, 1]} : vector<8x128xf32> to vector<8x32xf32>
    %80 = math.tanh %79 : vector<8x32xf32>
    %81 = vector.extract_strided_slice %78 {offsets = [0, 0], sizes = [8, 32], strides = [1, 1]} : vector<8x96xf32> to vector<8x32xf32>
    %82 = vector.extract_strided_slice %78 {offsets = [0, 32], sizes = [8, 32], strides = [1, 1]} : vector<8x96xf32> to vector<8x32xf32>
    %83 = vector.extract_strided_slice %78 {offsets = [0, 64], sizes = [8, 32], strides = [1, 1]} : vector<8x96xf32> to vector<8x32xf32>
    %84 = arith.mulf %82, %37 : vector<8x32xf32>
    %85 = arith.mulf %81, %80 : vector<8x32xf32>
    %86 = arith.addf %84, %85 : vector<8x32xf32>
    %87 = math.tanh %86 : vector<8x32xf32>
    %88 = arith.mulf %83, %87 : vector<8x32xf32>
    %89 = arith.truncf %88 : vector<8x32xf32> to vector<8x32xbf16>
    %c0_42 = arith.constant 0 : index
    %c0_43 = arith.constant 0 : index
    %90 = vector.load %arg7[%c0_42, %c0_43] : memref<32x128xbf16, #tpu.memory_space<vmem>>, vector<32x128xbf16>
    %cst_44 = arith.constant dense<0.000000e+00> : vector<8x128xf32>
    %91 = tpu.matmul %89, %90, %cst_44 {dimension_numbers = #tpu.dot_dimension_numbers<[1], [0], [0], [1], [0, 0, 1, 1], [], []>} : vector<8x32xbf16>, vector<32x128xbf16>, vector<8x128xf32> -> vector<8x128xf32>
    %c0_45 = arith.constant 0 : index
    %c0_46 = arith.constant 0 : index
    %92 = vector.load %arg8[%c0_45, %c0_46] : memref<32x128xbf16, #tpu.memory_space<vmem>>, vector<32x128xbf16>
    %cst_47 = arith.constant dense<0.000000e+00> : vector<8x128xf32>
    %93 = tpu.matmul %65, %92, %cst_47 {dimension_numbers = #tpu.dot_dimension_numbers<[1], [0], [0], [1], [0, 0, 1, 1], [], []>} : vector<8x32xbf16>, vector<32x128xbf16>, vector<8x128xf32> -> vector<8x128xf32>
    %94 = arith.addf %91, %93 : vector<8x128xf32>
    %c0_48 = arith.constant 0 : index
    %c0_49 = arith.constant 0 : index
    %95 = vector.load %arg9[%c0_48, %c0_49] : memref<1x128xf32, #tpu.memory_space<vmem>>, vector<1x128xf32>
    %96 = vector.broadcast %95 : vector<1x128xf32> to vector<8x128xf32>
    %97 = arith.addf %94, %96 : vector<8x128xf32>
    %98 = vector.extract_strided_slice %97 {offsets = [0, 0], sizes = [8, 96], strides = [1, 1]} : vector<8x128xf32> to vector<8x96xf32>
    %99 = arith.negf %98 : vector<8x96xf32>
    %100 = math.exp %99 : vector<8x96xf32>
    %cst_50 = arith.constant 1.000000e+00 : f32
    %101 = vector.broadcast %cst_50 : f32 to vector<8x96xf32>
    %102 = arith.addf %101, %100 : vector<8x96xf32>
    %103 = arith.divf %101, %102 : vector<8x96xf32>
    %104 = vector.extract_strided_slice %97 {offsets = [0, 96], sizes = [8, 32], strides = [1, 1]} : vector<8x128xf32> to vector<8x32xf32>
    %105 = math.tanh %104 : vector<8x32xf32>
    %106 = vector.extract_strided_slice %103 {offsets = [0, 0], sizes = [8, 32], strides = [1, 1]} : vector<8x96xf32> to vector<8x32xf32>
    %107 = vector.extract_strided_slice %103 {offsets = [0, 32], sizes = [8, 32], strides = [1, 1]} : vector<8x96xf32> to vector<8x32xf32>
    %108 = vector.extract_strided_slice %103 {offsets = [0, 64], sizes = [8, 32], strides = [1, 1]} : vector<8x96xf32> to vector<8x32xf32>
    %109 = arith.mulf %107, %62 : vector<8x32xf32>
    %110 = arith.mulf %106, %105 : vector<8x32xf32>
    %111 = arith.addf %109, %110 : vector<8x32xf32>
    %112 = math.tanh %111 : vector<8x32xf32>
    %113 = arith.mulf %108, %112 : vector<8x32xf32>
    %114 = arith.truncf %113 : vector<8x32xf32> to vector<8x32xbf16>
    %c1_51 = arith.constant 1 : index
    %c0_52 = arith.constant 0 : index
    %c0_53 = arith.constant 0 : index
    %115 = vector.load %arg10[%c1_51, %c0_52, %c0_53] : memref<8x8x32xf32, #tpu.memory_space<vmem>>, vector<1x8x32xf32>
    %116 = vector.shape_cast %115 : vector<1x8x32xf32> to vector<8x32xf32>
    %117 = vector.shape_cast %113 : vector<8x32xf32> to vector<1x8x32xf32>
    tpu.vector_store %arg10[%c1_51, %c0_52, %c0_53], %117 {strides = array<i32>} : memref<8x8x32xf32, #tpu.memory_space<vmem>>, vector<1x8x32xf32>,
    %c16 = arith.constant 16 : index
    %c0_54 = arith.constant 0 : index
    %118 = vector.load %arg13[%c16, %c0_54] : memref<64x128xf32, #tpu.memory_space<vmem>>, vector<8x128xf32>
    %c0_55 = arith.constant 0 : index
    %c0_56 = arith.constant 0 : index
    %119 = vector.load %arg5[%c0_55, %c0_56] : memref<32x128xbf16, #tpu.memory_space<vmem>>, vector<32x128xbf16>
    %cst_57 = arith.constant dense<0.000000e+00> : vector<8x128xf32>
    %120 = tpu.matmul %89, %119, %cst_57 {dimension_numbers = #tpu.dot_dimension_numbers<[1], [0], [0], [1], [0, 0, 1, 1], [], []>} : vector<8x32xbf16>, vector<32x128xbf16>, vector<8x128xf32> -> vector<8x128xf32>
    %121 = arith.addf %118, %120 : vector<8x128xf32>
    %122 = vector.extract_strided_slice %121 {offsets = [0, 0], sizes = [8, 96], strides = [1, 1]} : vector<8x128xf32> to vector<8x96xf32>
    %123 = arith.negf %122 : vector<8x96xf32>
    %124 = math.exp %123 : vector<8x96xf32>
    %cst_58 = arith.constant 1.000000e+00 : f32
    %125 = vector.broadcast %cst_58 : f32 to vector<8x96xf32>
    %126 = arith.addf %125, %124 : vector<8x96xf32>
    %127 = arith.divf %125, %126 : vector<8x96xf32>
    %128 = vector.extract_strided_slice %121 {offsets = [0, 96], sizes = [8, 32], strides = [1, 1]} : vector<8x128xf32> to vector<8x32xf32>
    %129 = math.tanh %128 : vector<8x32xf32>
    %130 = vector.extract_strided_slice %127 {offsets = [0, 0], sizes = [8, 32], strides = [1, 1]} : vector<8x96xf32> to vector<8x32xf32>
    %131 = vector.extract_strided_slice %127 {offsets = [0, 32], sizes = [8, 32], strides = [1, 1]} : vector<8x96xf32> to vector<8x32xf32>
    %132 = vector.extract_strided_slice %127 {offsets = [0, 64], sizes = [8, 32], strides = [1, 1]} : vector<8x96xf32> to vector<8x32xf32>
    %133 = arith.mulf %131, %86 : vector<8x32xf32>
    %134 = arith.mulf %130, %129 : vector<8x32xf32>
    %135 = arith.addf %133, %134 : vector<8x32xf32>
    %136 = math.tanh %135 : vector<8x32xf32>
    %137 = arith.mulf %132, %136 : vector<8x32xf32>
    %138 = arith.truncf %137 : vector<8x32xf32> to vector<8x32xbf16>
    %c0_59 = arith.constant 0 : index
    %c0_60 = arith.constant 0 : index
    %139 = vector.load %arg7[%c0_59, %c0_60] : memref<32x128xbf16, #tpu.memory_space<vmem>>, vector<32x128xbf16>
    %cst_61 = arith.constant dense<0.000000e+00> : vector<8x128xf32>
    %140 = tpu.matmul %138, %139, %cst_61 {dimension_numbers = #tpu.dot_dimension_numbers<[1], [0], [0], [1], [0, 0, 1, 1], [], []>} : vector<8x32xbf16>, vector<32x128xbf16>, vector<8x128xf32> -> vector<8x128xf32>
    %c0_62 = arith.constant 0 : index
    %c0_63 = arith.constant 0 : index
    %141 = vector.load %arg8[%c0_62, %c0_63] : memref<32x128xbf16, #tpu.memory_space<vmem>>, vector<32x128xbf16>
    %cst_64 = arith.constant dense<0.000000e+00> : vector<8x128xf32>
    %142 = tpu.matmul %114, %141, %cst_64 {dimension_numbers = #tpu.dot_dimension_numbers<[1], [0], [0], [1], [0, 0, 1, 1], [], []>} : vector<8x32xbf16>, vector<32x128xbf16>, vector<8x128xf32> -> vector<8x128xf32>
    %143 = arith.addf %140, %142 : vector<8x128xf32>
    %c0_65 = arith.constant 0 : index
    %c0_66 = arith.constant 0 : index
    %144 = vector.load %arg9[%c0_65, %c0_66] : memref<1x128xf32, #tpu.memory_space<vmem>>, vector<1x128xf32>
    %145 = vector.broadcast %144 : vector<1x128xf32> to vector<8x128xf32>
    %146 = arith.addf %143, %145 : vector<8x128xf32>
    %147 = vector.extract_strided_slice %146 {offsets = [0, 0], sizes = [8, 96], strides = [1, 1]} : vector<8x128xf32> to vector<8x96xf32>
    %148 = arith.negf %147 : vector<8x96xf32>
    %149 = math.exp %148 : vector<8x96xf32>
    %cst_67 = arith.constant 1.000000e+00 : f32
    %150 = vector.broadcast %cst_67 : f32 to vector<8x96xf32>
    %151 = arith.addf %150, %149 : vector<8x96xf32>
    %152 = arith.divf %150, %151 : vector<8x96xf32>
    %153 = vector.extract_strided_slice %146 {offsets = [0, 96], sizes = [8, 32], strides = [1, 1]} : vector<8x128xf32> to vector<8x32xf32>
    %154 = math.tanh %153 : vector<8x32xf32>
    %155 = vector.extract_strided_slice %152 {offsets = [0, 0], sizes = [8, 32], strides = [1, 1]} : vector<8x96xf32> to vector<8x32xf32>
    %156 = vector.extract_strided_slice %152 {offsets = [0, 32], sizes = [8, 32], strides = [1, 1]} : vector<8x96xf32> to vector<8x32xf32>
    %157 = vector.extract_strided_slice %152 {offsets = [0, 64], sizes = [8, 32], strides = [1, 1]} : vector<8x96xf32> to vector<8x32xf32>
    %158 = arith.mulf %156, %111 : vector<8x32xf32>
    %159 = arith.mulf %155, %154 : vector<8x32xf32>
    %160 = arith.addf %158, %159 : vector<8x32xf32>
    %161 = math.tanh %160 : vector<8x32xf32>
    %162 = arith.mulf %157, %161 : vector<8x32xf32>
    %163 = arith.truncf %162 : vector<8x32xf32> to vector<8x32xbf16>
    %c2 = arith.constant 2 : index
    %c0_68 = arith.constant 0 : index
    %c0_69 = arith.constant 0 : index
    %164 = vector.load %arg10[%c2, %c0_68, %c0_69] : memref<8x8x32xf32, #tpu.memory_space<vmem>>, vector<1x8x32xf32>
    %165 = vector.shape_cast %164 : vector<1x8x32xf32> to vector<8x32xf32>
    %166 = vector.shape_cast %162 : vector<8x32xf32> to vector<1x8x32xf32>
    tpu.vector_store %arg10[%c2, %c0_68, %c0_69], %166 {strides = array<i32>} : memref<8x8x32xf32, #tpu.memory_space<vmem>>, vector<1x8x32xf32>,
    %c24 = arith.constant 24 : index
    %c0_70 = arith.constant 0 : index
    %167 = vector.load %arg13[%c24, %c0_70] : memref<64x128xf32, #tpu.memory_space<vmem>>, vector<8x128xf32>
    %c0_71 = arith.constant 0 : index
    %c0_72 = arith.constant 0 : index
    %168 = vector.load %arg5[%c0_71, %c0_72] : memref<32x128xbf16, #tpu.memory_space<vmem>>, vector<32x128xbf16>
    %cst_73 = arith.constant dense<0.000000e+00> : vector<8x128xf32>
    %169 = tpu.matmul %138, %168, %cst_73 {dimension_numbers = #tpu.dot_dimension_numbers<[1], [0], [0], [1], [0, 0, 1, 1], [], []>} : vector<8x32xbf16>, vector<32x128xbf16>, vector<8x128xf32> -> vector<8x128xf32>
    %170 = arith.addf %167, %169 : vector<8x128xf32>
    %171 = vector.extract_strided_slice %170 {offsets = [0, 0], sizes = [8, 96], strides = [1, 1]} : vector<8x128xf32> to vector<8x96xf32>
    %172 = arith.negf %171 : vector<8x96xf32>
    %173 = math.exp %172 : vector<8x96xf32>
    %cst_74 = arith.constant 1.000000e+00 : f32
    %174 = vector.broadcast %cst_74 : f32 to vector<8x96xf32>
    %175 = arith.addf %174, %173 : vector<8x96xf32>
    %176 = arith.divf %174, %175 : vector<8x96xf32>
    %177 = vector.extract_strided_slice %170 {offsets = [0, 96], sizes = [8, 32], strides = [1, 1]} : vector<8x128xf32> to vector<8x32xf32>
    %178 = math.tanh %177 : vector<8x32xf32>
    %179 = vector.extract_strided_slice %176 {offsets = [0, 0], sizes = [8, 32], strides = [1, 1]} : vector<8x96xf32> to vector<8x32xf32>
    %180 = vector.extract_strided_slice %176 {offsets = [0, 32], sizes = [8, 32], strides = [1, 1]} : vector<8x96xf32> to vector<8x32xf32>
    %181 = vector.extract_strided_slice %176 {offsets = [0, 64], sizes = [8, 32], strides = [1, 1]} : vector<8x96xf32> to vector<8x32xf32>
    %182 = arith.mulf %180, %135 : vector<8x32xf32>
    %183 = arith.mulf %179, %178 : vector<8x32xf32>
    %184 = arith.addf %182, %183 : vector<8x32xf32>
    %185 = math.tanh %184 : vector<8x32xf32>
    %186 = arith.mulf %181, %185 : vector<8x32xf32>
    %187 = arith.truncf %186 : vector<8x32xf32> to vector<8x32xbf16>
    %c0_75 = arith.constant 0 : index
    %c0_76 = arith.constant 0 : index
    %188 = vector.load %arg7[%c0_75, %c0_76] : memref<32x128xbf16, #tpu.memory_space<vmem>>, vector<32x128xbf16>
    %cst_77 = arith.constant dense<0.000000e+00> : vector<8x128xf32>
    %189 = tpu.matmul %187, %188, %cst_77 {dimension_numbers = #tpu.dot_dimension_numbers<[1], [0], [0], [1], [0, 0, 1, 1], [], []>} : vector<8x32xbf16>, vector<32x128xbf16>, vector<8x128xf32> -> vector<8x128xf32>
    %c0_78 = arith.constant 0 : index
    %c0_79 = arith.constant 0 : index
    %190 = vector.load %arg8[%c0_78, %c0_79] : memref<32x128xbf16, #tpu.memory_space<vmem>>, vector<32x128xbf16>
    %cst_80 = arith.constant dense<0.000000e+00> : vector<8x128xf32>
    %191 = tpu.matmul %163, %190, %cst_80 {dimension_numbers = #tpu.dot_dimension_numbers<[1], [0], [0], [1], [0, 0, 1, 1], [], []>} : vector<8x32xbf16>, vector<32x128xbf16>, vector<8x128xf32> -> vector<8x128xf32>
    %192 = arith.addf %189, %191 : vector<8x128xf32>
    %c0_81 = arith.constant 0 : index
    %c0_82 = arith.constant 0 : index
    %193 = vector.load %arg9[%c0_81, %c0_82] : memref<1x128xf32, #tpu.memory_space<vmem>>, vector<1x128xf32>
    %194 = vector.broadcast %193 : vector<1x128xf32> to vector<8x128xf32>
    %195 = arith.addf %192, %194 : vector<8x128xf32>
    %196 = vector.extract_strided_slice %195 {offsets = [0, 0], sizes = [8, 96], strides = [1, 1]} : vector<8x128xf32> to vector<8x96xf32>
    %197 = arith.negf %196 : vector<8x96xf32>
    %198 = math.exp %197 : vector<8x96xf32>
    %cst_83 = arith.constant 1.000000e+00 : f32
    %199 = vector.broadcast %cst_83 : f32 to vector<8x96xf32>
    %200 = arith.addf %199, %198 : vector<8x96xf32>
    %201 = arith.divf %199, %200 : vector<8x96xf32>
    %202 = vector.extract_strided_slice %195 {offsets = [0, 96], sizes = [8, 32], strides = [1, 1]} : vector<8x128xf32> to vector<8x32xf32>
    %203 = math.tanh %202 : vector<8x32xf32>
    %204 = vector.extract_strided_slice %201 {offsets = [0, 0], sizes = [8, 32], strides = [1, 1]} : vector<8x96xf32> to vector<8x32xf32>
    %205 = vector.extract_strided_slice %201 {offsets = [0, 32], sizes = [8, 32], strides = [1, 1]} : vector<8x96xf32> to vector<8x32xf32>
    %206 = vector.extract_strided_slice %201 {offsets = [0, 64], sizes = [8, 32], strides = [1, 1]} : vector<8x96xf32> to vector<8x32xf32>
    %207 = arith.mulf %205, %160 : vector<8x32xf32>
    %208 = arith.mulf %204, %203 : vector<8x32xf32>
    %209 = arith.addf %207, %208 : vector<8x32xf32>
    %210 = math.tanh %209 : vector<8x32xf32>
    %211 = arith.mulf %206, %210 : vector<8x32xf32>
    %212 = arith.truncf %211 : vector<8x32xf32> to vector<8x32xbf16>
    %c3 = arith.constant 3 : index
    %c0_84 = arith.constant 0 : index
    %c0_85 = arith.constant 0 : index
    %213 = vector.load %arg10[%c3, %c0_84, %c0_85] : memref<8x8x32xf32, #tpu.memory_space<vmem>>, vector<1x8x32xf32>
    %214 = vector.shape_cast %213 : vector<1x8x32xf32> to vector<8x32xf32>
    %215 = vector.shape_cast %211 : vector<8x32xf32> to vector<1x8x32xf32>
    tpu.vector_store %arg10[%c3, %c0_84, %c0_85], %215 {strides = array<i32>} : memref<8x8x32xf32, #tpu.memory_space<vmem>>, vector<1x8x32xf32>,
    %c32 = arith.constant 32 : index
    %c0_86 = arith.constant 0 : index
    %216 = vector.load %arg13[%c32, %c0_86] : memref<64x128xf32, #tpu.memory_space<vmem>>, vector<8x128xf32>
    %c0_87 = arith.constant 0 : index
    %c0_88 = arith.constant 0 : index
    %217 = vector.load %arg5[%c0_87, %c0_88] : memref<32x128xbf16, #tpu.memory_space<vmem>>, vector<32x128xbf16>
    %cst_89 = arith.constant dense<0.000000e+00> : vector<8x128xf32>
    %218 = tpu.matmul %187, %217, %cst_89 {dimension_numbers = #tpu.dot_dimension_numbers<[1], [0], [0], [1], [0, 0, 1, 1], [], []>} : vector<8x32xbf16>, vector<32x128xbf16>, vector<8x128xf32> -> vector<8x128xf32>
    %219 = arith.addf %216, %218 : vector<8x128xf32>
    %220 = vector.extract_strided_slice %219 {offsets = [0, 0], sizes = [8, 96], strides = [1, 1]} : vector<8x128xf32> to vector<8x96xf32>
    %221 = arith.negf %220 : vector<8x96xf32>
    %222 = math.exp %221 : vector<8x96xf32>
    %cst_90 = arith.constant 1.000000e+00 : f32
    %223 = vector.broadcast %cst_90 : f32 to vector<8x96xf32>
    %224 = arith.addf %223, %222 : vector<8x96xf32>
    %225 = arith.divf %223, %224 : vector<8x96xf32>
    %226 = vector.extract_strided_slice %219 {offsets = [0, 96], sizes = [8, 32], strides = [1, 1]} : vector<8x128xf32> to vector<8x32xf32>
    %227 = math.tanh %226 : vector<8x32xf32>
    %228 = vector.extract_strided_slice %225 {offsets = [0, 0], sizes = [8, 32], strides = [1, 1]} : vector<8x96xf32> to vector<8x32xf32>
    %229 = vector.extract_strided_slice %225 {offsets = [0, 32], sizes = [8, 32], strides = [1, 1]} : vector<8x96xf32> to vector<8x32xf32>
    %230 = vector.extract_strided_slice %225 {offsets = [0, 64], sizes = [8, 32], strides = [1, 1]} : vector<8x96xf32> to vector<8x32xf32>
    %231 = arith.mulf %229, %184 : vector<8x32xf32>
    %232 = arith.mulf %228, %227 : vector<8x32xf32>
    %233 = arith.addf %231, %232 : vector<8x32xf32>
    %234 = math.tanh %233 : vector<8x32xf32>
    %235 = arith.mulf %230, %234 : vector<8x32xf32>
    %236 = arith.truncf %235 : vector<8x32xf32> to vector<8x32xbf16>
    %c0_91 = arith.constant 0 : index
    %c0_92 = arith.constant 0 : index
    %237 = vector.load %arg7[%c0_91, %c0_92] : memref<32x128xbf16, #tpu.memory_space<vmem>>, vector<32x128xbf16>
    %cst_93 = arith.constant dense<0.000000e+00> : vector<8x128xf32>
    %238 = tpu.matmul %236, %237, %cst_93 {dimension_numbers = #tpu.dot_dimension_numbers<[1], [0], [0], [1], [0, 0, 1, 1], [], []>} : vector<8x32xbf16>, vector<32x128xbf16>, vector<8x128xf32> -> vector<8x128xf32>
    %c0_94 = arith.constant 0 : index
    %c0_95 = arith.constant 0 : index
    %239 = vector.load %arg8[%c0_94, %c0_95] : memref<32x128xbf16, #tpu.memory_space<vmem>>, vector<32x128xbf16>
    %cst_96 = arith.constant dense<0.000000e+00> : vector<8x128xf32>
    %240 = tpu.matmul %212, %239, %cst_96 {dimension_numbers = #tpu.dot_dimension_numbers<[1], [0], [0], [1], [0, 0, 1, 1], [], []>} : vector<8x32xbf16>, vector<32x128xbf16>, vector<8x128xf32> -> vector<8x128xf32>
    %241 = arith.addf %238, %240 : vector<8x128xf32>
    %c0_97 = arith.constant 0 : index
    %c0_98 = arith.constant 0 : index
    %242 = vector.load %arg9[%c0_97, %c0_98] : memref<1x128xf32, #tpu.memory_space<vmem>>, vector<1x128xf32>
    %243 = vector.broadcast %242 : vector<1x128xf32> to vector<8x128xf32>
    %244 = arith.addf %241, %243 : vector<8x128xf32>
    %245 = vector.extract_strided_slice %244 {offsets = [0, 0], sizes = [8, 96], strides = [1, 1]} : vector<8x128xf32> to vector<8x96xf32>
    %246 = arith.negf %245 : vector<8x96xf32>
    %247 = math.exp %246 : vector<8x96xf32>
    %cst_99 = arith.constant 1.000000e+00 : f32
    %248 = vector.broadcast %cst_99 : f32 to vector<8x96xf32>
    %249 = arith.addf %248, %247 : vector<8x96xf32>
    %250 = arith.divf %248, %249 : vector<8x96xf32>
    %251 = vector.extract_strided_slice %244 {offsets = [0, 96], sizes = [8, 32], strides = [1, 1]} : vector<8x128xf32> to vector<8x32xf32>
    %252 = math.tanh %251 : vector<8x32xf32>
    %253 = vector.extract_strided_slice %250 {offsets = [0, 0], sizes = [8, 32], strides = [1, 1]} : vector<8x96xf32> to vector<8x32xf32>
    %254 = vector.extract_strided_slice %250 {offsets = [0, 32], sizes = [8, 32], strides = [1, 1]} : vector<8x96xf32> to vector<8x32xf32>
    %255 = vector.extract_strided_slice %250 {offsets = [0, 64], sizes = [8, 32], strides = [1, 1]} : vector<8x96xf32> to vector<8x32xf32>
    %256 = arith.mulf %254, %209 : vector<8x32xf32>
    %257 = arith.mulf %253, %252 : vector<8x32xf32>
    %258 = arith.addf %256, %257 : vector<8x32xf32>
    %259 = math.tanh %258 : vector<8x32xf32>
    %260 = arith.mulf %255, %259 : vector<8x32xf32>
    %261 = arith.truncf %260 : vector<8x32xf32> to vector<8x32xbf16>
    %c4 = arith.constant 4 : index
    %c0_100 = arith.constant 0 : index
    %c0_101 = arith.constant 0 : index
    %262 = vector.load %arg10[%c4, %c0_100, %c0_101] : memref<8x8x32xf32, #tpu.memory_space<vmem>>, vector<1x8x32xf32>
    %263 = vector.shape_cast %262 : vector<1x8x32xf32> to vector<8x32xf32>
    %264 = vector.shape_cast %260 : vector<8x32xf32> to vector<1x8x32xf32>
    tpu.vector_store %arg10[%c4, %c0_100, %c0_101], %264 {strides = array<i32>} : memref<8x8x32xf32, #tpu.memory_space<vmem>>, vector<1x8x32xf32>,
    %c40 = arith.constant 40 : index
    %c0_102 = arith.constant 0 : index
    %265 = vector.load %arg13[%c40, %c0_102] : memref<64x128xf32, #tpu.memory_space<vmem>>, vector<8x128xf32>
    %c0_103 = arith.constant 0 : index
    %c0_104 = arith.constant 0 : index
    %266 = vector.load %arg5[%c0_103, %c0_104] : memref<32x128xbf16, #tpu.memory_space<vmem>>, vector<32x128xbf16>
    %cst_105 = arith.constant dense<0.000000e+00> : vector<8x128xf32>
    %267 = tpu.matmul %236, %266, %cst_105 {dimension_numbers = #tpu.dot_dimension_numbers<[1], [0], [0], [1], [0, 0, 1, 1], [], []>} : vector<8x32xbf16>, vector<32x128xbf16>, vector<8x128xf32> -> vector<8x128xf32>
    %268 = arith.addf %265, %267 : vector<8x128xf32>
    %269 = vector.extract_strided_slice %268 {offsets = [0, 0], sizes = [8, 96], strides = [1, 1]} : vector<8x128xf32> to vector<8x96xf32>
    %270 = arith.negf %269 : vector<8x96xf32>
    %271 = math.exp %270 : vector<8x96xf32>
    %cst_106 = arith.constant 1.000000e+00 : f32
    %272 = vector.broadcast %cst_106 : f32 to vector<8x96xf32>
    %273 = arith.addf %272, %271 : vector<8x96xf32>
    %274 = arith.divf %272, %273 : vector<8x96xf32>
    %275 = vector.extract_strided_slice %268 {offsets = [0, 96], sizes = [8, 32], strides = [1, 1]} : vector<8x128xf32> to vector<8x32xf32>
    %276 = math.tanh %275 : vector<8x32xf32>
    %277 = vector.extract_strided_slice %274 {offsets = [0, 0], sizes = [8, 32], strides = [1, 1]} : vector<8x96xf32> to vector<8x32xf32>
    %278 = vector.extract_strided_slice %274 {offsets = [0, 32], sizes = [8, 32], strides = [1, 1]} : vector<8x96xf32> to vector<8x32xf32>
    %279 = vector.extract_strided_slice %274 {offsets = [0, 64], sizes = [8, 32], strides = [1, 1]} : vector<8x96xf32> to vector<8x32xf32>
    %280 = arith.mulf %278, %233 : vector<8x32xf32>
    %281 = arith.mulf %277, %276 : vector<8x32xf32>
    %282 = arith.addf %280, %281 : vector<8x32xf32>
    %283 = math.tanh %282 : vector<8x32xf32>
    %284 = arith.mulf %279, %283 : vector<8x32xf32>
    %285 = arith.truncf %284 : vector<8x32xf32> to vector<8x32xbf16>
    %c0_107 = arith.constant 0 : index
    %c0_108 = arith.constant 0 : index
    %286 = vector.load %arg7[%c0_107, %c0_108] : memref<32x128xbf16, #tpu.memory_space<vmem>>, vector<32x128xbf16>
    %cst_109 = arith.constant dense<0.000000e+00> : vector<8x128xf32>
    %287 = tpu.matmul %285, %286, %cst_109 {dimension_numbers = #tpu.dot_dimension_numbers<[1], [0], [0], [1], [0, 0, 1, 1], [], []>} : vector<8x32xbf16>, vector<32x128xbf16>, vector<8x128xf32> -> vector<8x128xf32>
    %c0_110 = arith.constant 0 : index
    %c0_111 = arith.constant 0 : index
    %288 = vector.load %arg8[%c0_110, %c0_111] : memref<32x128xbf16, #tpu.memory_space<vmem>>, vector<32x128xbf16>
    %cst_112 = arith.constant dense<0.000000e+00> : vector<8x128xf32>
    %289 = tpu.matmul %261, %288, %cst_112 {dimension_numbers = #tpu.dot_dimension_numbers<[1], [0], [0], [1], [0, 0, 1, 1], [], []>} : vector<8x32xbf16>, vector<32x128xbf16>, vector<8x128xf32> -> vector<8x128xf32>
    %290 = arith.addf %287, %289 : vector<8x128xf32>
    %c0_113 = arith.constant 0 : index
    %c0_114 = arith.constant 0 : index
    %291 = vector.load %arg9[%c0_113, %c0_114] : memref<1x128xf32, #tpu.memory_space<vmem>>, vector<1x128xf32>
    %292 = vector.broadcast %291 : vector<1x128xf32> to vector<8x128xf32>
    %293 = arith.addf %290, %292 : vector<8x128xf32>
    %294 = vector.extract_strided_slice %293 {offsets = [0, 0], sizes = [8, 96], strides = [1, 1]} : vector<8x128xf32> to vector<8x96xf32>
    %295 = arith.negf %294 : vector<8x96xf32>
    %296 = math.exp %295 : vector<8x96xf32>
    %cst_115 = arith.constant 1.000000e+00 : f32
    %297 = vector.broadcast %cst_115 : f32 to vector<8x96xf32>
    %298 = arith.addf %297, %296 : vector<8x96xf32>
    %299 = arith.divf %297, %298 : vector<8x96xf32>
    %300 = vector.extract_strided_slice %293 {offsets = [0, 96], sizes = [8, 32], strides = [1, 1]} : vector<8x128xf32> to vector<8x32xf32>
    %301 = math.tanh %300 : vector<8x32xf32>
    %302 = vector.extract_strided_slice %299 {offsets = [0, 0], sizes = [8, 32], strides = [1, 1]} : vector<8x96xf32> to vector<8x32xf32>
    %303 = vector.extract_strided_slice %299 {offsets = [0, 32], sizes = [8, 32], strides = [1, 1]} : vector<8x96xf32> to vector<8x32xf32>
    %304 = vector.extract_strided_slice %299 {offsets = [0, 64], sizes = [8, 32], strides = [1, 1]} : vector<8x96xf32> to vector<8x32xf32>
    %305 = arith.mulf %303, %258 : vector<8x32xf32>
    %306 = arith.mulf %302, %301 : vector<8x32xf32>
    %307 = arith.addf %305, %306 : vector<8x32xf32>
    %308 = math.tanh %307 : vector<8x32xf32>
    %309 = arith.mulf %304, %308 : vector<8x32xf32>
    %310 = arith.truncf %309 : vector<8x32xf32> to vector<8x32xbf16>
    %c5 = arith.constant 5 : index
    %c0_116 = arith.constant 0 : index
    %c0_117 = arith.constant 0 : index
    %311 = vector.load %arg10[%c5, %c0_116, %c0_117] : memref<8x8x32xf32, #tpu.memory_space<vmem>>, vector<1x8x32xf32>
    %312 = vector.shape_cast %311 : vector<1x8x32xf32> to vector<8x32xf32>
    %313 = vector.shape_cast %309 : vector<8x32xf32> to vector<1x8x32xf32>
    tpu.vector_store %arg10[%c5, %c0_116, %c0_117], %313 {strides = array<i32>} : memref<8x8x32xf32, #tpu.memory_space<vmem>>, vector<1x8x32xf32>,
    %c48 = arith.constant 48 : index
    %c0_118 = arith.constant 0 : index
    %314 = vector.load %arg13[%c48, %c0_118] : memref<64x128xf32, #tpu.memory_space<vmem>>, vector<8x128xf32>
    %c0_119 = arith.constant 0 : index
    %c0_120 = arith.constant 0 : index
    %315 = vector.load %arg5[%c0_119, %c0_120] : memref<32x128xbf16, #tpu.memory_space<vmem>>, vector<32x128xbf16>
    %cst_121 = arith.constant dense<0.000000e+00> : vector<8x128xf32>
    %316 = tpu.matmul %285, %315, %cst_121 {dimension_numbers = #tpu.dot_dimension_numbers<[1], [0], [0], [1], [0, 0, 1, 1], [], []>} : vector<8x32xbf16>, vector<32x128xbf16>, vector<8x128xf32> -> vector<8x128xf32>
    %317 = arith.addf %314, %316 : vector<8x128xf32>
    %318 = vector.extract_strided_slice %317 {offsets = [0, 0], sizes = [8, 96], strides = [1, 1]} : vector<8x128xf32> to vector<8x96xf32>
    %319 = arith.negf %318 : vector<8x96xf32>
    %320 = math.exp %319 : vector<8x96xf32>
    %cst_122 = arith.constant 1.000000e+00 : f32
    %321 = vector.broadcast %cst_122 : f32 to vector<8x96xf32>
    %322 = arith.addf %321, %320 : vector<8x96xf32>
    %323 = arith.divf %321, %322 : vector<8x96xf32>
    %324 = vector.extract_strided_slice %317 {offsets = [0, 96], sizes = [8, 32], strides = [1, 1]} : vector<8x128xf32> to vector<8x32xf32>
    %325 = math.tanh %324 : vector<8x32xf32>
    %326 = vector.extract_strided_slice %323 {offsets = [0, 0], sizes = [8, 32], strides = [1, 1]} : vector<8x96xf32> to vector<8x32xf32>
    %327 = vector.extract_strided_slice %323 {offsets = [0, 32], sizes = [8, 32], strides = [1, 1]} : vector<8x96xf32> to vector<8x32xf32>
    %328 = vector.extract_strided_slice %323 {offsets = [0, 64], sizes = [8, 32], strides = [1, 1]} : vector<8x96xf32> to vector<8x32xf32>
    %329 = arith.mulf %327, %282 : vector<8x32xf32>
    %330 = arith.mulf %326, %325 : vector<8x32xf32>
    %331 = arith.addf %329, %330 : vector<8x32xf32>
    %332 = math.tanh %331 : vector<8x32xf32>
    %333 = arith.mulf %328, %332 : vector<8x32xf32>
    %334 = arith.truncf %333 : vector<8x32xf32> to vector<8x32xbf16>
    %c0_123 = arith.constant 0 : index
    %c0_124 = arith.constant 0 : index
    %335 = vector.load %arg7[%c0_123, %c0_124] : memref<32x128xbf16, #tpu.memory_space<vmem>>, vector<32x128xbf16>
    %cst_125 = arith.constant dense<0.000000e+00> : vector<8x128xf32>
    %336 = tpu.matmul %334, %335, %cst_125 {dimension_numbers = #tpu.dot_dimension_numbers<[1], [0], [0], [1], [0, 0, 1, 1], [], []>} : vector<8x32xbf16>, vector<32x128xbf16>, vector<8x128xf32> -> vector<8x128xf32>
    %c0_126 = arith.constant 0 : index
    %c0_127 = arith.constant 0 : index
    %337 = vector.load %arg8[%c0_126, %c0_127] : memref<32x128xbf16, #tpu.memory_space<vmem>>, vector<32x128xbf16>
    %cst_128 = arith.constant dense<0.000000e+00> : vector<8x128xf32>
    %338 = tpu.matmul %310, %337, %cst_128 {dimension_numbers = #tpu.dot_dimension_numbers<[1], [0], [0], [1], [0, 0, 1, 1], [], []>} : vector<8x32xbf16>, vector<32x128xbf16>, vector<8x128xf32> -> vector<8x128xf32>
    %339 = arith.addf %336, %338 : vector<8x128xf32>
    %c0_129 = arith.constant 0 : index
    %c0_130 = arith.constant 0 : index
    %340 = vector.load %arg9[%c0_129, %c0_130] : memref<1x128xf32, #tpu.memory_space<vmem>>, vector<1x128xf32>
    %341 = vector.broadcast %340 : vector<1x128xf32> to vector<8x128xf32>
    %342 = arith.addf %339, %341 : vector<8x128xf32>
    %343 = vector.extract_strided_slice %342 {offsets = [0, 0], sizes = [8, 96], strides = [1, 1]} : vector<8x128xf32> to vector<8x96xf32>
    %344 = arith.negf %343 : vector<8x96xf32>
    %345 = math.exp %344 : vector<8x96xf32>
    %cst_131 = arith.constant 1.000000e+00 : f32
    %346 = vector.broadcast %cst_131 : f32 to vector<8x96xf32>
    %347 = arith.addf %346, %345 : vector<8x96xf32>
    %348 = arith.divf %346, %347 : vector<8x96xf32>
    %349 = vector.extract_strided_slice %342 {offsets = [0, 96], sizes = [8, 32], strides = [1, 1]} : vector<8x128xf32> to vector<8x32xf32>
    %350 = math.tanh %349 : vector<8x32xf32>
    %351 = vector.extract_strided_slice %348 {offsets = [0, 0], sizes = [8, 32], strides = [1, 1]} : vector<8x96xf32> to vector<8x32xf32>
    %352 = vector.extract_strided_slice %348 {offsets = [0, 32], sizes = [8, 32], strides = [1, 1]} : vector<8x96xf32> to vector<8x32xf32>
    %353 = vector.extract_strided_slice %348 {offsets = [0, 64], sizes = [8, 32], strides = [1, 1]} : vector<8x96xf32> to vector<8x32xf32>
    %354 = arith.mulf %352, %307 : vector<8x32xf32>
    %355 = arith.mulf %351, %350 : vector<8x32xf32>
    %356 = arith.addf %354, %355 : vector<8x32xf32>
    %357 = math.tanh %356 : vector<8x32xf32>
    %358 = arith.mulf %353, %357 : vector<8x32xf32>
    %359 = arith.truncf %358 : vector<8x32xf32> to vector<8x32xbf16>
    %c6 = arith.constant 6 : index
    %c0_132 = arith.constant 0 : index
    %c0_133 = arith.constant 0 : index
    %360 = vector.load %arg10[%c6, %c0_132, %c0_133] : memref<8x8x32xf32, #tpu.memory_space<vmem>>, vector<1x8x32xf32>
    %361 = vector.shape_cast %360 : vector<1x8x32xf32> to vector<8x32xf32>
    %362 = vector.shape_cast %358 : vector<8x32xf32> to vector<1x8x32xf32>
    tpu.vector_store %arg10[%c6, %c0_132, %c0_133], %362 {strides = array<i32>} : memref<8x8x32xf32, #tpu.memory_space<vmem>>, vector<1x8x32xf32>,
    %c56 = arith.constant 56 : index
    %c0_134 = arith.constant 0 : index
    %363 = vector.load %arg13[%c56, %c0_134] : memref<64x128xf32, #tpu.memory_space<vmem>>, vector<8x128xf32>
    %c0_135 = arith.constant 0 : index
    %c0_136 = arith.constant 0 : index
    %364 = vector.load %arg5[%c0_135, %c0_136] : memref<32x128xbf16, #tpu.memory_space<vmem>>, vector<32x128xbf16>
    %cst_137 = arith.constant dense<0.000000e+00> : vector<8x128xf32>
    %365 = tpu.matmul %334, %364, %cst_137 {dimension_numbers = #tpu.dot_dimension_numbers<[1], [0], [0], [1], [0, 0, 1, 1], [], []>} : vector<8x32xbf16>, vector<32x128xbf16>, vector<8x128xf32> -> vector<8x128xf32>
    %366 = arith.addf %363, %365 : vector<8x128xf32>
    %367 = vector.extract_strided_slice %366 {offsets = [0, 0], sizes = [8, 96], strides = [1, 1]} : vector<8x128xf32> to vector<8x96xf32>
    %368 = arith.negf %367 : vector<8x96xf32>
    %369 = math.exp %368 : vector<8x96xf32>
    %cst_138 = arith.constant 1.000000e+00 : f32
    %370 = vector.broadcast %cst_138 : f32 to vector<8x96xf32>
    %371 = arith.addf %370, %369 : vector<8x96xf32>
    %372 = arith.divf %370, %371 : vector<8x96xf32>
    %373 = vector.extract_strided_slice %366 {offsets = [0, 96], sizes = [8, 32], strides = [1, 1]} : vector<8x128xf32> to vector<8x32xf32>
    %374 = math.tanh %373 : vector<8x32xf32>
    %375 = vector.extract_strided_slice %372 {offsets = [0, 0], sizes = [8, 32], strides = [1, 1]} : vector<8x96xf32> to vector<8x32xf32>
    %376 = vector.extract_strided_slice %372 {offsets = [0, 32], sizes = [8, 32], strides = [1, 1]} : vector<8x96xf32> to vector<8x32xf32>
    %377 = vector.extract_strided_slice %372 {offsets = [0, 64], sizes = [8, 32], strides = [1, 1]} : vector<8x96xf32> to vector<8x32xf32>
    %378 = arith.mulf %376, %331 : vector<8x32xf32>
    %379 = arith.mulf %375, %374 : vector<8x32xf32>
    %380 = arith.addf %378, %379 : vector<8x32xf32>
    %381 = math.tanh %380 : vector<8x32xf32>
    %382 = arith.mulf %377, %381 : vector<8x32xf32>
    %383 = arith.truncf %382 : vector<8x32xf32> to vector<8x32xbf16>
    %c0_139 = arith.constant 0 : index
    %c0_140 = arith.constant 0 : index
    %384 = vector.load %arg7[%c0_139, %c0_140] : memref<32x128xbf16, #tpu.memory_space<vmem>>, vector<32x128xbf16>
    %cst_141 = arith.constant dense<0.000000e+00> : vector<8x128xf32>
    %385 = tpu.matmul %383, %384, %cst_141 {dimension_numbers = #tpu.dot_dimension_numbers<[1], [0], [0], [1], [0, 0, 1, 1], [], []>} : vector<8x32xbf16>, vector<32x128xbf16>, vector<8x128xf32> -> vector<8x128xf32>
    %c0_142 = arith.constant 0 : index
    %c0_143 = arith.constant 0 : index
    %386 = vector.load %arg8[%c0_142, %c0_143] : memref<32x128xbf16, #tpu.memory_space<vmem>>, vector<32x128xbf16>
    %cst_144 = arith.constant dense<0.000000e+00> : vector<8x128xf32>
    %387 = tpu.matmul %359, %386, %cst_144 {dimension_numbers = #tpu.dot_dimension_numbers<[1], [0], [0], [1], [0, 0, 1, 1], [], []>} : vector<8x32xbf16>, vector<32x128xbf16>, vector<8x128xf32> -> vector<8x128xf32>
    %388 = arith.addf %385, %387 : vector<8x128xf32>
    %c0_145 = arith.constant 0 : index
    %c0_146 = arith.constant 0 : index
    %389 = vector.load %arg9[%c0_145, %c0_146] : memref<1x128xf32, #tpu.memory_space<vmem>>, vector<1x128xf32>
    %390 = vector.broadcast %389 : vector<1x128xf32> to vector<8x128xf32>
    %391 = arith.addf %388, %390 : vector<8x128xf32>
    %392 = vector.extract_strided_slice %391 {offsets = [0, 0], sizes = [8, 96], strides = [1, 1]} : vector<8x128xf32> to vector<8x96xf32>
    %393 = arith.negf %392 : vector<8x96xf32>
    %394 = math.exp %393 : vector<8x96xf32>
    %cst_147 = arith.constant 1.000000e+00 : f32
    %395 = vector.broadcast %cst_147 : f32 to vector<8x96xf32>
    %396 = arith.addf %395, %394 : vector<8x96xf32>
    %397 = arith.divf %395, %396 : vector<8x96xf32>
    %398 = vector.extract_strided_slice %391 {offsets = [0, 96], sizes = [8, 32], strides = [1, 1]} : vector<8x128xf32> to vector<8x32xf32>
    %399 = math.tanh %398 : vector<8x32xf32>
    %400 = vector.extract_strided_slice %397 {offsets = [0, 0], sizes = [8, 32], strides = [1, 1]} : vector<8x96xf32> to vector<8x32xf32>
    %401 = vector.extract_strided_slice %397 {offsets = [0, 32], sizes = [8, 32], strides = [1, 1]} : vector<8x96xf32> to vector<8x32xf32>
    %402 = vector.extract_strided_slice %397 {offsets = [0, 64], sizes = [8, 32], strides = [1, 1]} : vector<8x96xf32> to vector<8x32xf32>
    %403 = arith.mulf %401, %356 : vector<8x32xf32>
    %404 = arith.mulf %400, %399 : vector<8x32xf32>
    %405 = arith.addf %403, %404 : vector<8x32xf32>
    %406 = math.tanh %405 : vector<8x32xf32>
    %407 = arith.mulf %402, %406 : vector<8x32xf32>
    %408 = arith.truncf %407 : vector<8x32xf32> to vector<8x32xbf16>
    %c7 = arith.constant 7 : index
    %c0_148 = arith.constant 0 : index
    %c0_149 = arith.constant 0 : index
    %409 = vector.load %arg10[%c7, %c0_148, %c0_149] : memref<8x8x32xf32, #tpu.memory_space<vmem>>, vector<1x8x32xf32>
    %410 = vector.shape_cast %409 : vector<1x8x32xf32> to vector<8x32xf32>
    %411 = vector.shape_cast %407 : vector<8x32xf32> to vector<1x8x32xf32>
    tpu.vector_store %arg10[%c7, %c0_148, %c0_149], %411 {strides = array<i32>} : memref<8x8x32xf32, #tpu.memory_space<vmem>>, vector<1x8x32xf32>,
    %412 = arith.extf %383 : vector<8x32xbf16> to vector<8x32xf32>
    %c0_150 = arith.constant 0 : index
    %c0_151 = arith.constant 0 : index
    %c0_152 = arith.constant 0 : index
    %413 = vector.load %arg11[%c0_150, %c0_151, %c0_152] : memref<2x8x32xf32, #tpu.memory_space<vmem>>, vector<1x8x32xf32>
    %414 = vector.shape_cast %413 : vector<1x8x32xf32> to vector<8x32xf32>
    %415 = vector.shape_cast %412 : vector<8x32xf32> to vector<1x8x32xf32>
    tpu.vector_store %arg11[%c0_150, %c0_151, %c0_152], %415 {strides = array<i32>} : memref<2x8x32xf32, #tpu.memory_space<vmem>>, vector<1x8x32xf32>,
    %c0_153 = arith.constant 0 : index
    %c0_154 = arith.constant 0 : index
    %c0_155 = arith.constant 0 : index
    %416 = vector.load %arg12[%c0_153, %c0_154, %c0_155] : memref<2x8x32xf32, #tpu.memory_space<vmem>>, vector<1x8x32xf32>
    %417 = vector.shape_cast %416 : vector<1x8x32xf32> to vector<8x32xf32>
    %418 = vector.shape_cast %380 : vector<8x32xf32> to vector<1x8x32xf32>
    tpu.vector_store %arg12[%c0_153, %c0_154, %c0_155], %418 {strides = array<i32>} : memref<2x8x32xf32, #tpu.memory_space<vmem>>, vector<1x8x32xf32>,
    %419 = arith.extf %408 : vector<8x32xbf16> to vector<8x32xf32>
    %c1_156 = arith.constant 1 : index
    %c0_157 = arith.constant 0 : index
    %c0_158 = arith.constant 0 : index
    %420 = vector.load %arg11[%c1_156, %c0_157, %c0_158] : memref<2x8x32xf32, #tpu.memory_space<vmem>>, vector<1x8x32xf32>
    %421 = vector.shape_cast %420 : vector<1x8x32xf32> to vector<8x32xf32>
    %422 = vector.shape_cast %419 : vector<8x32xf32> to vector<1x8x32xf32>
    tpu.vector_store %arg11[%c1_156, %c0_157, %c0_158], %422 {strides = array<i32>} : memref<2x8x32xf32, #tpu.memory_space<vmem>>, vector<1x8x32xf32>,
    %c1_159 = arith.constant 1 : index
    %c0_160 = arith.constant 0 : index
    %c0_161 = arith.constant 0 : index
    %423 = vector.load %arg12[%c1_159, %c0_160, %c0_161] : memref<2x8x32xf32, #tpu.memory_space<vmem>>, vector<1x8x32xf32>
    %424 = vector.shape_cast %423 : vector<1x8x32xf32> to vector<8x32xf32>
    %425 = vector.shape_cast %405 : vector<8x32xf32> to vector<1x8x32xf32>
    tpu.vector_store %arg12[%c1_159, %c0_160, %c0_161], %425 {strides = array<i32>} : memref<2x8x32xf32, #tpu.memory_space<vmem>>, vector<1x8x32xf32>,
    return
  }
  func.func @transform_0(%arg0: i32) -> (i32, i32) {
    %c0_i32 = arith.constant 0 : i32
    %c0_i32_0 = arith.constant 0 : i32
    return %arg0, %c0_i32 : i32, i32
  }
  func.func @transform_1(%arg0: i32) -> (i32, i32, i32) {
    %c0_i32 = arith.constant 0 : i32
    %c0_i32_0 = arith.constant 0 : i32
    %c0_i32_1 = arith.constant 0 : i32
    %c0_i32_2 = arith.constant 0 : i32
    return %c0_i32, %c0_i32_0, %c0_i32_1 : i32, i32, i32
  }
  func.func @transform_2(%arg0: i32) -> (i32, i32, i32) {
    %c0_i32 = arith.constant 0 : i32
    %c0_i32_0 = arith.constant 0 : i32
    %c0_i32_1 = arith.constant 0 : i32
    %c0_i32_2 = arith.constant 0 : i32
    return %c0_i32, %c0_i32_0, %c0_i32_1 : i32, i32, i32
  }
  func.func @transform_3(%arg0: i32) -> (i32, i32) {
    %c0_i32 = arith.constant 0 : i32
    %c0_i32_0 = arith.constant 0 : i32
    %c0_i32_1 = arith.constant 0 : i32
    return %c0_i32, %c0_i32_0 : i32, i32
  }
  func.func @transform_4(%arg0: i32) -> (i32, i32) {
    %c0_i32 = arith.constant 0 : i32
    %c0_i32_0 = arith.constant 0 : i32
    %c0_i32_1 = arith.constant 0 : i32
    return %c0_i32, %c0_i32_0 : i32, i32
  }
  func.func @transform_5(%arg0: i32) -> (i32, i32) {
    %c0_i32 = arith.constant 0 : i32
    %c0_i32_0 = arith.constant 0 : i32
    %c0_i32_1 = arith.constant 0 : i32
    return %c0_i32, %c0_i32_0 : i32, i32
  }
  func.func @transform_6(%arg0: i32) -> (i32, i32) {
    %c0_i32 = arith.constant 0 : i32
    %c0_i32_0 = arith.constant 0 : i32
    %c0_i32_1 = arith.constant 0 : i32
    return %c0_i32, %c0_i32_0 : i32, i32
  }
  func.func @transform_7(%arg0: i32) -> (i32, i32) {
    %c0_i32 = arith.constant 0 : i32
    %c0_i32_0 = arith.constant 0 : i32
    %c0_i32_1 = arith.constant 0 : i32
    return %c0_i32, %c0_i32_0 : i32, i32
  }
  func.func @transform_8(%arg0: i32) -> (i32, i32) {
    %c0_i32 = arith.constant 0 : i32
    %c0_i32_0 = arith.constant 0 : i32
    %c0_i32_1 = arith.constant 0 : i32
    return %c0_i32, %c0_i32_0 : i32, i32
  }
  func.func @transform_9(%arg0: i32) -> (i32, i32, i32) {
    %c0_i32 = arith.constant 0 : i32
    %c0_i32_0 = arith.constant 0 : i32
    %c0_i32_1 = arith.constant 0 : i32
    return %arg0, %c0_i32, %c0_i32_0 : i32, i32, i32
  }
  func.func @transform_10(%arg0: i32) -> (i32, i32, i32) {
    %c0_i32 = arith.constant 0 : i32
    %c0_i32_0 = arith.constant 0 : i32
    %c0_i32_1 = arith.constant 0 : i32
    %c0_i32_2 = arith.constant 0 : i32
    return %c0_i32, %c0_i32_0, %c0_i32_1 : i32, i32, i32
  }
  func.func @transform_11(%arg0: i32) -> (i32, i32, i32) {
    %c0_i32 = arith.constant 0 : i32
    %c0_i32_0 = arith.constant 0 : i32
    %c0_i32_1 = arith.constant 0 : i32
    %c0_i32_2 = arith.constant 0 : i32
    return %c0_i32, %c0_i32_0, %c0_i32_1 : i32, i32, i32
  }
}

</mosaic_0001>

<bundles_post_ra>
// kernel: tpu_custom_call.1
= control target key start
LH: loop header
LB: loop body
LE: loop exit
PB: predicated region body
PF: predicated region fallthrough
CT: control target
= control target key end

     0   :  { %17 = vsyncpa [#allocation4], 0  ;;  %s3596_s0 = inlined_call_operand.vmem [shape: bf16[64,16], index: 0, kind: input, shape index: {}]   ;;  %s3597_s1 = inlined_call_operand.vmem [shape: f32[2,8,32], index: 1, kind: input, shape index: {}]   ;;  %s3598_s2 = inlined_call_operand.vmem [shape: f32[2,8,32], index: 2, kind: input, shape index: {}]   ;;  %s3599_s3 = inlined_call_operand.hbm [shape: bf16[16,128], index: 3, kind: input, shape index: {}]   ;;  %s3600_s4 = inlined_call_operand.vmem [shape: bf16[32,128], index: 4, kind: input, shape index: {}]   ;;  %s3601_s5 = inlined_call_operand.vmem [shape: f32[1,128], index: 5, kind: input, shape index: {}]   ;;  %s3602_s6 = inlined_call_operand.hbm [shape: bf16[32,128], index: 6, kind: input, shape index: {}]   ;;  %s3603_s7 = inlined_call_operand.vmem [shape: bf16[32,128], index: 7, kind: input, shape index: {}]   ;;  %s3604_s8 = inlined_call_operand.vmem [shape: f32[1,128], index: 8, kind: input, shape index: {}]   ;;  %s3605_s9 = inlined_call_operand.hbm [shape: f32[8,8,32], index: 9, kind: output, shape index: {0}]   ;;  %s3606_s10 = inlined_call_operand.hbm [shape: f32[2,8,32], index: 10, kind: output, shape index: {1}]   ;;  %s3607_s11 = inlined_call_operand.hbm [shape: f32[2,8,32], index: 11, kind: output, shape index: {2}]  }
   0x1   :  { %18 = vsyncpa [#allocation7], 0 }
   0x2   :  { %19 = vsyncpa [#allocation5], 0 }
   0x3   :  { %20 = vsyncpa [#allocation10], 0  ;;  %s2966_s17 = smov [#allocation3]   ;;  %s2848_s21 = scalar_lea.hbm %s3599_s3, 128 }
   0x4   :  { %s32_s18 = sshll.u32 %s2966_s17, 4  ;;  %p2849_p0 = scmp.ne.s32.totalorder %s3599_s3, %s2848_s21  ;;  %s33_s18 = int_to_ptr.vmem [resolvable:$true] %s32_s18 }
   0x5   :  { %p2852_p1 = scmp.lt.u32.totalorder %s2848_s21, %s3599_s3 }
   0x7   :  { %p2854_p2 = pnand %p2852_p1, %p2849_p0 }
   0x9   :  { %2857 = shalt.err (!%p2854_p2)
}
   0xa   :  { %s2858_s26 = scalar_lea.vmem %s33_s18, 128  ;;  %p2863_p4 = scmp.lt.s32.totalorder %s33_s18, %s33_s18 }
   0xb   :  { %p2859_p3 = scmp.ne.s32.totalorder %s33_s18, %s2858_s26  ;;  %p2864_p5 = scmp.lt.s32.totalorder %s2858_s26, %s2858_s26 }
   0xd   :  { %p2865_p6 = por %p2864_p5, %p2863_p4 }
   0xf   :  { %p2866_p7 = pnand %p2865_p6, %p2859_p3 }
  0x11   :  { %2869 = shalt.err (!%p2866_p7)
}
  0x12   :  { %s2967_s27 = smov 64   ;;  %s2968_s28 = smov 4  }
  0x13   :  { %38 = dma.hbm_to_vmem [thread:$0]  %s3599_s3, 128, %s33_s18, [#allocation4], %s2967_s27, %s2967_s27, %s2968_s28  }
  0x14   :  { %s2969_s12 = smov [#allocation6]   ;;  %s2870_s16 = scalar_lea.hbm %s3602_s6, 256 }
  0x15   :  { %s48_s13 = sshll.u32 %s2969_s12, 4  ;;  %p2871_p8 = scmp.ne.s32.totalorder %s3602_s6, %s2870_s16  ;;  %s49_s13 = int_to_ptr.vmem [resolvable:$true] %s48_s13 }
  0x16   :  { %p2874_p9 = scmp.lt.u32.totalorder %s2870_s16, %s3602_s6 }
  0x18   :  { %p2876_p10 = pnand %p2874_p9, %p2871_p8 }
  0x1a   :  { %2879 = shalt.err (!%p2876_p10)
}
  0x1b   :  { %s2880_s22 = scalar_lea.vmem %s49_s13, 256  ;;  %p2885_p12 = scmp.lt.s32.totalorder %s49_s13, %s49_s13 }
  0x1c   :  { %p2881_p11 = scmp.ne.s32.totalorder %s49_s13, %s2880_s22  ;;  %p2886_p13 = scmp.lt.s32.totalorder %s2880_s22, %s2880_s22 }
  0x1e   :  { %p2887_p0 = por %p2886_p13, %p2885_p12 }
  0x20   :  { %p2888_p1 = pnand %p2887_p0, %p2881_p11 }
  0x22   :  { %2891 = shalt.err (!%p2888_p1)
}
  0x23   :  { %54 = dma.hbm_to_vmem [thread:$0]  %s3602_s6, 256, %s49_s13, [#allocation7], %s2967_s27, %s2967_s27, %s2968_s28  }
  0x24   :  { %2958 = dma.done.wait [#allocation4], 128  }
  0x25   :  { %2959 = vsyncadd [#allocation4], 4294967168 }
  0x26   :  { %2960 = dma.done.wait [#allocation7], 256  }
  0x27   :  { %2961 = vsyncadd [#allocation7], 4294967040  ;;  %v2970_v0 = vmov 0.0   ;;  %vm2971_vm0 = vmmov 0   ;;  %v2666_v1 = vld [vmem:[#allocation3] sm:$0xff]   ;;  %vm122_vm1 = vcmask 130048  }
  0x28   :  { %2456 = vmatprep.subr.bf16.mxu1 %v2970_v0  ;;  %2460 = vmatprep.mubr.msk.bf16.mxu1 %vm2971_vm0, %v2970_v0  ;;  %v2667_v2 = vld [vmem:[%s3600_s4] sm:$0xff]   ;;  %v2669_v4 = vld [vmem:[%s3596_s0 + $0x8] sm:$0xff]   ;;  %vm72_vm2 = vcmask 261120   ;;  %s2972_s19 = smov 32   ;;  %v2673_v35 = vld [vmem:[%s3596_s0 + $0x10] sm:$0xff]  }
  0x29   :  { %2446 = vmatprep.subr.bf16.mxu0 %v2666_v1  ;;  %v2668_v3 = vld [vmem:[%s3596_s0] sm:$0xff]   ;;  %2457 = vmatpush3.bf16.msra.mxu1 %v2667_v2  ;;  %v2670_v5 = vld [vmem:[%s3600_s4 + $0x8] sm:$0xff]   ;;  %v2675_v36 = vld [vmem:[%s3596_s0 + $0x18] sm:$0xff]  }
  0x2a   :  { %2447 = vmatpush3.bf16.msra.mxu0 %v2666_v1  ;;  %2448 = vmatprep.mubr.msk.bf16.mxu0 %vm122_vm1, %v2668_v3  ;;  %v70_v6 = vld [vmem:[%s3597_s1] sm:$0xff]  ;;  %v2672_v34 = vld [vmem:[#allocation6] sm:$0xff]   ;;  %v2676_v39 = vld [vmem:[#allocation6 + $0x8] sm:$0xff]  }
  0x2b   :  { %2458 = vmatprep.subr.bf16.mxu1 %v2970_v0  ;;  %2472 = vmatprep.subr.bf16.mxu0 %v2970_v0  ;;  %73 = vst.msk [vmem:[#allocation9] sm:$0xff] %vm72_vm2, %v70_v6  ;;  %v75_v9 = vld [vmem:[%s3598_s2] sm:$0xff]  ;;  %v71_v37 = vld [vmem:[%s3597_s1 + $0x8] sm:$0xff] }
  0x2c   :  { %77 = vst.msk [vmem:[#allocation11] sm:$0xff] %vm72_vm2, %v75_v9  ;;  %v3107_v14 = vld [vmem:[%s3601_s5] ss:$0 sm:$0xff]  ;;  %v2674_v38 = vld [vmem:[%s3603_s7 + $0x8] sm:$0xff]   ;;  %74 = vst.msk [vmem:[#allocation9 + $0x8] sm:$0xff] %vm72_vm2, %v71_v37 }
  0x2d   :  { %2449 = vmatmul.mubr.msk.bf16.vlgmr.msra.gmra.mrb[0].mxu0 %vm122_vm1, %v2669_v4  ;;  %2459 = vmatpush3.bf16.msra.mxu1 %v2670_v5  ;;  %v2671_v33 = vld [vmem:[%s3603_s7] sm:$0xff]   ;;  %v2678_v44 = vld [vmem:[%s3600_s4 + $0x8] sm:$0xff]  }
  0x2e   :  { %2464 = vmatprep.subr.bf16.mxu1 %v2970_v0  ;;  %2473 = vmatpush3.bf16.msra.mxu0 %v2672_v34  ;;  %v2677_v42 = vld [vmem:[%s3600_s4] sm:$0xff]   ;;  %v76_v57 = vld [vmem:[%s3598_s2 + $0x8] sm:$0xff] }
  0x2f   :  { %2452 = vmatprep.mubr.msk.bf16.mxu0 %vm122_vm1, %v2673_v35  ;;  %2474 = vmatprep.subr.bf16.mxu0 %v2970_v0  ;;  %78 = vst.msk [vmem:[#allocation11 + $0x8] sm:$0xff] %vm72_vm2, %v76_v57  ;;  %v3176_v60 = vld [vmem:[%s3604_s8] ss:$0 sm:$0xff]  ;;  %v2679_v34 = vld [vmem:[#allocation6] sm:$0xff]  }
  0x30   :  { %v2680_v35 = vld [vmem:[%s3603_s7] sm:$0xff]  }
  0x32   :  { %v208_v7 = vld [vmem:[#allocation9] sm:$0xff]  ;;  %2475 = vmatpush3.bf16.msra.mxu0 %v2676_v39 }
  0x33   :  { %v209_v8 = vpack.c.bf16 %v208_v7, %v208_v7  ;;  %v213_v22 = vld [vmem:[#allocation11] sm:$0xff]  ;;  %2488 = vmatprep.subr.bf16.mxu0 %v2970_v0  ;;  %v211_v41 = vld [vmem:[#allocation9 + $0x8] sm:$0xff] }
  0x34   :  { %v212_v43 = vpack.c.bf16 %v211_v41, %v211_v41 }
  0x35   :  { %2461 = vmatmul.mubr.msk.bf16.vlgmr.msra.gmra.mrb[0].mxu1 %vm72_vm2, %v209_v8  ;;  %2453 = vmatmul.mubr.msk.bf16.gmra.mrb[4].mxu0 %vm122_vm1, %v2675_v36  ;;  %v2681_v36 = vld [vmem:[#allocation6 + $0x8] sm:$0xff]  }
  0x36   :  { %2468 = vmatprep.mubr.msk.bf16.mxu1 %vm2971_vm0, %v2970_v0  ;;  %2465 = vmatpush3.bf16.msra.mxu1 %v2671_v33 }
  0x37   :  { %2466 = vmatprep.subr.bf16.mxu1 %v2970_v0  ;;  %2476 = vmatprep.mubr.msk.bf16.mxu0 %vm2971_vm0, %v2970_v0 }
  0x3a   :  { %2467 = vmatpush3.bf16.msra.mxu1 %v2674_v38 }
  0x3b   :  { %2480 = vmatprep.subr.bf16.mxu1 %v2970_v0 }
  0x3d   :  { %2469 = vmatmul.mubr.msk.bf16.vlgmr.msra.gmra.mrb[4].mxu1 %vm72_vm2, %v212_v43 }
  0x3e   :  { %2481 = vmatpush3.bf16.msra.mxu1 %v2677_v42  ;;  %2484 = vmatprep.mubr.msk.bf16.mxu1 %vm2971_vm0, %v2970_v0 }
  0x3f   :  { %2482 = vmatprep.subr.bf16.mxu1 %v2970_v0 }
  0x42   :  { %2483 = vmatpush3.bf16.msra.mxu1 %v2678_v44 }
  0x43   :  { %2496 = vmatprep.subr.bf16.mxu1 %v2970_v0 }
 0x100   :  { %v3098_v10 = vpop.f32.mrb[0].mxu0 }
 0x101   :  { %v169_v11 = vpop.f32.mrb[1].mxu0 }
 0x102   :  { %v3100_v12 = vpop.f32.mrb[2].mxu0  ;;  %v170_v15 = vadd.f32 %v3107_v14, %v169_v11  ;;  %v215_v11 = vld [vmem:[#allocation11 + $0x8] sm:$0xff] }
 0x103   :  { %v3102_v13 = vpop.f32.mrb[3].mxu0 }
 0x104   :  { %v173_v58 = vadd.f32 %v3107_v14, %v3102_v13 }
 0x108   :  { %v271_v16 = vpop.f32.mrb[0].mxu1  ;;  %v3153_v48 = vpop.f32.mrb[4].mxu0 }
 0x109   :  { %v277_v17 = vadd.f32 %v271_v16, %v170_v15  ;;  %v2462_v18 = vpop.f32.mrb[1].mxu1  ;;  %v3155_v49 = vpop.f32.mrb[5].mxu0 }
 0x10a   :  { %v274_v19 = vpop.f32.mrb[2].mxu1  ;;  %v3157_v50 = vpop.f32.mrb[6].mxu0 }
 0x10b   :  { %2719 = vtanh.f32 %v277_v17  ;;  %v2463_v20 = vpop.f32.mrb[3].mxu1  ;;  %v2276_v23 = vmul.f32 -1.442695, %v277_v17  ;;  %v3159_v51 = vpop.f32.mrb[7].mxu0 }
 0x10d   :  { %2721 = vpow2.f32 %v2276_v23 }
 0x110   :  { %v364_v52 = vpop.f32.mrb[4].mxu1 }
 0x111   :  { %v2470_v53 = vpop.f32.mrb[5].mxu1 }
 0x112   :  { %v367_v54 = vpop.f32.mrb[6].mxu1 }
 0x113   :  { %v2471_v55 = vpop.f32.mrb[7].mxu1 }
 0x115   :  { %v2720_v21 = vpop.eup %2719 }
 0x116   :  { %291 = vrot.lane.b32.xlu0 %v2720_v21, %s2972_s19 }
 0x117   :  { %v2722_v24 = vpop.eup %2721 }
 0x118   :  { %v281_v25 = vadd.f32 1.0, %v2722_v24 }
 0x11a   :  { %286 = vrot.lane.b32.xlu0 %v213_v22, %s2972_s19  ;;  %2723 = vrcp.f32 %v281_v25 }
 0x124   :  { %v2724_v26 = vpop.eup %2723 }
 0x188   :  { %v292_v27 = vpop.permute.xlu0 %291 }
 0x189   :  { %v294_v28 = vmul.f32 %v2724_v26, %v292_v27 }
 0x18b   :  { %296 = vrot.lane.b32.xlu1 %v294_v28, %s2972_s19 }
 0x18c   :  { %v287_v29 = vpop.permute.xlu0 %286 }
 0x18d   :  { %v289_v30 = vmul.f32 %v2724_v26, %v287_v29 }
 0x1fd   :  { %v297_v31 = vpop.permute.xlu1 %296 }
 0x1fe   :  { %v3113_v32 = vadd.f32 %v297_v31, %v289_v30 }
 0x200   :  { %2725 = vtanh.f32 %v3113_v32 }
 0x20a   :  { %v2726_v40 = vpop.eup %2725 }
 0x20b   :  { %302 = vrot.lane.b32.xlu1 %v2726_v40, %s2972_s19 }
 0x27d   :  { %v303_v45 = vpop.permute.xlu1 %302 }
 0x27e   :  { %v305_v46 = vmul.f32 %v2724_v26, %v303_v45 }
 0x280   :  { %v306_v47 = vpack.c.bf16 %v305_v46, %v305_v46  ;;  %v2683_v46 = vld [vmem:[%s3600_s4] sm:$0xff]  }
 0x282   :  { %371 = vrot.lane.b32.xlu0 %v306_v47, %s2967_s27 }
 0x2f4   :  { %v372_v56 = vpop.permute.xlu0 %371 }
 0x2f5   :  { %2477 = vmatmul.mubr.msk.bf16.vlgmr.msra.gmra.mrb[8].mxu0 %vm72_vm2, %v372_v56  ;;  %2485 = vmatmul.mubr.msk.bf16.vlgmr.msra.gmra.mrb[8].mxu1 %vm72_vm2, %v372_v56 }
 0x2f6   :  { %2500 = vmatprep.mubr.msk.bf16.mxu1 %vm2971_vm0, %v2970_v0  ;;  %2492 = vmatprep.mubr.msk.bf16.mxu0 %vm2971_vm0, %v2970_v0 }
 0x2f7   :  { %2497 = vmatpush3.bf16.msra.mxu1 %v2679_v34  ;;  %2489 = vmatpush3.bf16.msra.mxu0 %v2680_v35  ;;  %v2689_v35 = vld [vmem:[#allocation6 + $0x8] sm:$0xff]  }
 0x2f8   :  { %2498 = vmatprep.subr.bf16.mxu1 %v2970_v0  ;;  %2490 = vmatprep.subr.bf16.mxu0 %v2970_v0 }
 0x2fb   :  { %2499 = vmatpush3.bf16.msra.mxu1 %v2681_v36 }
 0x2fc   :  { %2512 = vmatprep.subr.bf16.mxu1 %v2970_v0 }
 0x3c8   :  { %v422_v59 = vpop.f32.mrb[8].mxu0  ;;  %v521_v61 = vpop.f32.mrb[8].mxu1 }
 0x3c9   :  { %v423_v62 = vadd.f32 %v422_v59, %v364_v52  ;;  %v527_v63 = vadd.f32 %v521_v61, %v173_v58  ;;  %v2478_v1 = vpop.f32.mrb[9].mxu0  ;;  %v2486_v2 = vpop.f32.mrb[9].mxu1  ;;  %v2684_v52 = vld [vmem:[%s3600_s4 + $0x8] sm:$0xff]  }
 0x3ca   :  { %v425_v3 = vpop.f32.mrb[10].mxu0  ;;  %v524_v4 = vpop.f32.mrb[10].mxu1  ;;  %v178_v1 = vadd.f32 %v3098_v10, %v3107_v14 }
 0x3cb   :  { %v435_v5 = vadd.f32 %v3176_v60, %v423_v62  ;;  %2727 = vtanh.f32 %v527_v63  ;;  %v2479_v6 = vpop.f32.mrb[11].mxu0  ;;  %v2487_v7 = vpop.f32.mrb[11].mxu1  ;;  %v2288_v13 = vmul.f32 -1.442695, %v527_v63 }
 0x3cd   :  { %2729 = vtanh.f32 %v435_v5  ;;  %v2284_v15 = vmul.f32 -1.442695, %v435_v5 }
 0x3ce   :  { %2731 = vpow2.f32 %v2288_v13 }
 0x3cf   :  { %2733 = vpow2.f32 %v2284_v15 }
 0x3d5   :  { %v2728_v8 = vpop.eup %2727 }
 0x3d6   :  { %537 = vrot.lane.b32.xlu0 %v2728_v8, %s2972_s19 }
 0x3d7   :  { %v2730_v9 = vpop.eup %2729 }
 0x3d8   :  { %449 = vrot.lane.b32.xlu1 %v2730_v9, %s2972_s19  ;;  %v2732_v16 = vpop.eup %2731 }
 0x3d9   :  { %v2734_v17 = vpop.eup %2733  ;;  %v531_v18 = vadd.f32 1.0, %v2732_v16 }
 0x3da   :  { %v439_v19 = vadd.f32 1.0, %v2734_v17 }
 0x3db   :  { %2735 = vrcp.f32 %v531_v18 }
 0x3dc   :  { %444 = vrot.lane.b32.xlu1 %v215_v11, %s2972_s19  ;;  %2737 = vrcp.f32 %v439_v19 }
 0x3e5   :  { %v2736_v20 = vpop.eup %2735 }
 0x3e6   :  { %v2738_v23 = vpop.eup %2737  ;;  %v535_v27 = vmul.f32 %v2736_v20, %v3113_v32  ;;  %v2682_v32 = vld [vmem:[%s3603_s7 + $0x8] sm:$0xff]  }
 0x3e7   :  { %2491 = vmatpush3.bf16.msra.mxu0 %v2682_v32 }
 0x3e8   :  { %2504 = vmatprep.subr.bf16.mxu0 %v2970_v0 }
 0x448   :  { %v538_v21 = vpop.permute.xlu0 %537 }
 0x449   :  { %v540_v22 = vmul.f32 %v2736_v20, %v538_v21 }
 0x44a   :  { %v450_v24 = vpop.permute.xlu1 %449 }
 0x44b   :  { %v452_v25 = vmul.f32 %v2738_v23, %v450_v24  ;;  %542 = vrot.lane.b32.xlu1 %v540_v22, %s2972_s19 }
 0x44d   :  { %454 = vrot.lane.b32.xlu0 %v452_v25, %s2972_s19 }
 0x44e   :  { %v445_v26 = vpop.permute.xlu1 %444 }
 0x44f   :  { %v447_v29 = vmul.f32 %v2738_v23, %v445_v26 }
 0x4bd   :  { %v543_v28 = vpop.permute.xlu1 %542 }
 0x4be   :  { %v3185_v30 = vadd.f32 %v543_v28, %v535_v27 }
 0x4bf   :  { %v455_v31 = vpop.permute.xlu0 %454 }
 0x4c0   :  { %2739 = vtanh.f32 %v3185_v30  ;;  %v3188_v33 = vadd.f32 %v455_v31, %v447_v29  ;;  %v2685_v29 = vld [vmem:[%s3603_s7] sm:$0xff]   ;;  %v2687_v31 = vld [vmem:[#allocation6] sm:$0xff]  }
 0x4c2   :  { %2741 = vtanh.f32 %v3188_v33 }
 0x4ca   :  { %v2740_v37 = vpop.eup %2739 }
 0x4cb   :  { %548 = vrot.lane.b32.xlu1 %v2740_v37, %s2972_s19 }
 0x4cc   :  { %v2742_v38 = vpop.eup %2741 }
 0x4cd   :  { %460 = vrot.lane.b32.xlu0 %v2742_v38, %s2972_s19 }
 0x53d   :  { %v549_v39 = vpop.permute.xlu1 %548 }
 0x53e   :  { %v551_v40 = vmul.f32 %v2736_v20, %v549_v39 }
 0x53f   :  { %v461_v41 = vpop.permute.xlu0 %460 }
 0x540   :  { %v552_v42 = vpack.c.bf16 %v551_v40, %v551_v40  ;;  %v3203_v43 = vmul.f32 %v2738_v23, %v461_v41  ;;  %v2688_v41 = vld [vmem:[%s3600_s4] sm:$0xff]  }
 0x542   :  { %620 = vrot.lane.b32.xlu1 %v552_v42, %s2967_s27  ;;  %v464_v44 = vpack.c.bf16 %v3203_v43, %v3203_v43 }
 0x544   :  { %562 = vrot.lane.b32.xlu0 %v464_v44, %s2967_s27  ;;  %v2690_v44 = vld [vmem:[%s3600_s4 + $0x8] sm:$0xff]  }
 0x5b4   :  { %v621_v45 = vpop.permute.xlu1 %620 }
 0x5b5   :  { %2501 = vmatmul.mubr.msk.bf16.vlgmr.msra.gmra.mrb[12].mxu1 %vm72_vm2, %v621_v45 }
 0x5b6   :  { %v563_v47 = vpop.permute.xlu0 %562  ;;  %2516 = vmatprep.mubr.msk.bf16.mxu1 %vm2971_vm0, %v2970_v0  ;;  %2513 = vmatpush3.bf16.msra.mxu1 %v2685_v29 }
 0x5b7   :  { %2493 = vmatmul.mubr.msk.bf16.vlgmr.msra.gmra.mrb[12].mxu0 %vm72_vm2, %v563_v47  ;;  %2514 = vmatprep.subr.bf16.mxu1 %v2970_v0 }
 0x5b8   :  { %2505 = vmatpush3.bf16.msra.mxu0 %v2683_v46  ;;  %2508 = vmatprep.mubr.msk.bf16.mxu0 %vm2971_vm0, %v2970_v0 }
 0x5b9   :  { %2506 = vmatprep.subr.bf16.mxu0 %v2970_v0 }
 0x5bc   :  { %2507 = vmatpush3.bf16.msra.mxu0 %v2684_v52 }
 0x5bd   :  { %2520 = vmatprep.subr.bf16.mxu0 %v2970_v0 }
 0x5bf   :  { %2509 = vmatmul.mubr.msk.bf16.vlgmr.msra.gmra.mrb[16].mxu0 %vm72_vm2, %v621_v45 }
 0x5c0   :  { %2524 = vmatprep.mubr.msk.bf16.mxu0 %vm2971_vm0, %v2970_v0  ;;  %2521 = vmatpush3.bf16.msra.mxu0 %v2687_v31 }
 0x5c1   :  { %2522 = vmatprep.subr.bf16.mxu0 %v2970_v0 }
 0x5c4   :  { %2523 = vmatpush3.bf16.msra.mxu0 %v2689_v35 }
 0x5c5   :  { %2536 = vmatprep.subr.bf16.mxu0 %v2970_v0 }
 0x688   :  { %v671_v53 = vpop.f32.mrb[12].mxu1 }
 0x689   :  { %v2502_v54 = vpop.f32.mrb[13].mxu1 }
 0x68a   :  { %v613_v55 = vpop.f32.mrb[12].mxu0  ;;  %v674_v56 = vpop.f32.mrb[14].mxu1 }
 0x68b   :  { %v672_v57 = vadd.f32 %v671_v53, %v613_v55  ;;  %v2494_v58 = vpop.f32.mrb[13].mxu0  ;;  %v2503_v59 = vpop.f32.mrb[15].mxu1  ;;  %v181_v55 = vadd.f32 %v3100_v12, %v3107_v14 }
 0x68c   :  { %v616_v61 = vpop.f32.mrb[14].mxu0 }
 0x68d   :  { %v684_v62 = vadd.f32 %v3176_v60, %v672_v57  ;;  %v2495_v63 = vpop.f32.mrb[15].mxu0 }
 0x68f   :  { %2743 = vtanh.f32 %v684_v62  ;;  %v2296_v9 = vmul.f32 -1.442695, %v684_v62 }
 0x692   :  { %v767_v2 = vpop.f32.mrb[16].mxu0 }
 0x693   :  { %v773_v3 = vadd.f32 %v767_v2, %v178_v1  ;;  %v2510_v4 = vpop.f32.mrb[17].mxu0 }
 0x694   :  { %v770_v5 = vpop.f32.mrb[18].mxu0 }
 0x695   :  { %2745 = vtanh.f32 %v773_v3  ;;  %v2511_v6 = vpop.f32.mrb[19].mxu0  ;;  %v2300_v11 = vmul.f32 -1.442695, %v773_v3 }
 0x696   :  { %2747 = vpow2.f32 %v2296_v9 }
 0x697   :  { %2749 = vpow2.f32 %v2300_v11 }
 0x699   :  { %v2744_v7 = vpop.eup %2743 }
 0x69a   :  { %694 = vrot.lane.b32.xlu0 %v2744_v7, %s2972_s19 }
 0x69f   :  { %v2746_v8 = vpop.eup %2745 }
 0x6a0   :  { %783 = vrot.lane.b32.xlu1 %v2746_v8, %s2972_s19  ;;  %v2748_v13 = vpop.eup %2747 }
 0x6a1   :  { %v688_v15 = vadd.f32 1.0, %v2748_v13  ;;  %v2750_v16 = vpop.eup %2749 }
 0x6a2   :  { %v777_v10 = vadd.f32 1.0, %v2750_v16 }
 0x6a3   :  { %2751 = vrcp.f32 %v688_v15 }
 0x6a4   :  { %2753 = vrcp.f32 %v777_v10 }
 0x6ad   :  { %v2752_v17 = vpop.eup %2751 }
 0x6ae   :  { %v2754_v20 = vpop.eup %2753  ;;  %v692_v23 = vmul.f32 %v2752_v17, %v3188_v33  ;;  %v2686_v33 = vld [vmem:[%s3603_s7 + $0x8] sm:$0xff]  }
 0x6af   :  { %v781_v26 = vmul.f32 %v2754_v20, %v3185_v30  ;;  %2515 = vmatpush3.bf16.msra.mxu1 %v2686_v33 }
 0x6b0   :  { %2528 = vmatprep.subr.bf16.mxu1 %v2970_v0 }
 0x70c   :  { %v695_v18 = vpop.permute.xlu0 %694 }
 0x70d   :  { %v697_v19 = vmul.f32 %v2752_v17, %v695_v18 }
 0x70f   :  { %699 = vrot.lane.b32.xlu0 %v697_v19, %s2972_s19 }
 0x712   :  { %v784_v21 = vpop.permute.xlu1 %783 }
 0x713   :  { %v786_v22 = vmul.f32 %v2754_v20, %v784_v21 }
 0x715   :  { %788 = vrot.lane.b32.xlu1 %v786_v22, %s2972_s19 }
 0x781   :  { %v700_v24 = vpop.permute.xlu0 %699 }
 0x782   :  { %v3234_v25 = vadd.f32 %v700_v24, %v692_v23 }
 0x784   :  { %2755 = vtanh.f32 %v3234_v25 }
 0x787   :  { %v789_v27 = vpop.permute.xlu1 %788 }
 0x788   :  { %v3238_v28 = vadd.f32 %v789_v27, %v781_v26  ;;  %v2691_v26 = vld [vmem:[%s3603_s7] sm:$0xff]   ;;  %v2692_v27 = vld [vmem:[#allocation6] sm:$0xff]  }
 0x78a   :  { %2757 = vtanh.f32 %v3238_v28 }
 0x78e   :  { %v2756_v34 = vpop.eup %2755 }
 0x78f   :  { %705 = vrot.lane.b32.xlu0 %v2756_v34, %s2972_s19 }
 0x794   :  { %v2758_v30 = vpop.eup %2757 }
 0x795   :  { %794 = vrot.lane.b32.xlu1 %v2758_v30, %s2972_s19 }
 0x801   :  { %v706_v36 = vpop.permute.xlu0 %705 }
 0x802   :  { %v3253_v32 = vmul.f32 %v2752_v17, %v706_v36 }
 0x804   :  { %v709_v37 = vpack.c.bf16 %v3253_v32, %v3253_v32 }
 0x806   :  { %808 = vrot.lane.b32.xlu0 %v709_v37, %s2967_s27 }
 0x807   :  { %v795_v38 = vpop.permute.xlu1 %794 }
 0x808   :  { %v797_v39 = vmul.f32 %v2754_v20, %v795_v38  ;;  %v2695_v38 = vld [vmem:[%s3600_s4] sm:$0xff]  }
 0x80a   :  { %v798_v40 = vpack.c.bf16 %v797_v39, %v797_v39 }
 0x80c   :  { %866 = vrot.lane.b32.xlu1 %v798_v40, %s2967_s27 }
 0x878   :  { %v809_v42 = vpop.permute.xlu0 %808 }
 0x879   :  { %2517 = vmatmul.mubr.msk.bf16.vlgmr.msra.gmra.mrb[16].mxu1 %vm72_vm2, %v809_v42 }
 0x87a   :  { %2529 = vmatpush3.bf16.msra.mxu1 %v2688_v41  ;;  %2532 = vmatprep.mubr.msk.bf16.mxu1 %vm2971_vm0, %v2970_v0  ;;  %v2696_v41 = vld [vmem:[%s3600_s4 + $0x8] sm:$0xff]  }
 0x87b   :  { %2530 = vmatprep.subr.bf16.mxu1 %v2970_v0 }
 0x87e   :  { %2531 = vmatpush3.bf16.msra.mxu1 %v2690_v44  ;;  %v867_v45 = vpop.permute.xlu1 %866 }
 0x87f   :  { %2525 = vmatmul.mubr.msk.bf16.vlgmr.msra.gmra.mrb[20].mxu0 %vm72_vm2, %v867_v45  ;;  %2544 = vmatprep.subr.bf16.mxu1 %v2970_v0 }
 0x880   :  { %2540 = vmatprep.mubr.msk.bf16.mxu0 %vm2971_vm0, %v2970_v0  ;;  %2537 = vmatpush3.bf16.msra.mxu0 %v2691_v26 }
 0x881   :  { %2533 = vmatmul.mubr.msk.bf16.vlgmr.msra.gmra.mrb[20].mxu1 %vm72_vm2, %v867_v45  ;;  %2538 = vmatprep.subr.bf16.mxu0 %v2970_v0 }
 0x882   :  { %2548 = vmatprep.mubr.msk.bf16.mxu1 %vm2971_vm0, %v2970_v0  ;;  %2545 = vmatpush3.bf16.msra.mxu1 %v2692_v27  ;;  %v2701_v27 = vld [vmem:[#allocation6 + $0x8] sm:$0xff]  }
 0x883   :  { %2546 = vmatprep.subr.bf16.mxu1 %v2970_v0 }
 0x94c   :  { %v859_v46 = vpop.f32.mrb[16].mxu1 }
 0x94d   :  { %v2518_v47 = vpop.f32.mrb[17].mxu1 }
 0x94e   :  { %v862_v52 = vpop.f32.mrb[18].mxu1 }
 0x94f   :  { %v2519_v53 = vpop.f32.mrb[19].mxu1 }
 0x952   :  { %v917_v54 = vpop.f32.mrb[20].mxu0 }
 0x953   :  { %v918_v56 = vadd.f32 %v917_v54, %v859_v46  ;;  %v2526_v57 = vpop.f32.mrb[21].mxu0 }
 0x954   :  { %v920_v58 = vpop.f32.mrb[22].mxu0  ;;  %v1013_v59 = vpop.f32.mrb[20].mxu1  ;;  %v186_v57 = vadd.f32 %v3107_v14, %v3155_v49 }
 0x955   :  { %v930_v61 = vadd.f32 %v3176_v60, %v918_v56  ;;  %v1019_v62 = vadd.f32 %v1013_v59, %v181_v55  ;;  %v2527_v63 = vpop.f32.mrb[23].mxu0  ;;  %v2534_v1 = vpop.f32.mrb[21].mxu1 }
 0x956   :  { %v1016_v2 = vpop.f32.mrb[22].mxu1 }
 0x957   :  { %2759 = vtanh.f32 %v930_v61  ;;  %v2535_v3 = vpop.f32.mrb[23].mxu1  ;;  %v2308_v12 = vmul.f32 -1.442695, %v930_v61  ;;  %v2312_v6 = vmul.f32 -1.442695, %v1019_v62 }
 0x958   :  { %2761 = vtanh.f32 %v1019_v62 }
 0x959   :  { %2763 = vpow2.f32 %v2308_v12 }
 0x95a   :  { %2765 = vpow2.f32 %v2312_v6 }
 0x961   :  { %v2760_v4 = vpop.eup %2759 }
 0x962   :  { %v2762_v5 = vpop.eup %2761  ;;  %940 = vrot.lane.b32.xlu0 %v2760_v4, %s2972_s19 }
 0x963   :  { %1029 = vrot.lane.b32.xlu1 %v2762_v5, %s2972_s19  ;;  %v2764_v7 = vpop.eup %2763 }
 0x964   :  { %v2766_v8 = vpop.eup %2765  ;;  %v934_v9 = vadd.f32 1.0, %v2764_v7 }
 0x965   :  { %v1023_v11 = vadd.f32 1.0, %v2766_v8 }
 0x966   :  { %2767 = vrcp.f32 %v934_v9 }
 0x967   :  { %2769 = vrcp.f32 %v1023_v11 }
 0x970   :  { %v2768_v13 = vpop.eup %2767 }
 0x971   :  { %v2770_v16 = vpop.eup %2769  ;;  %v938_v19 = vmul.f32 %v2768_v13, %v3234_v25  ;;  %v2693_v25 = vld [vmem:[%s3603_s7 + $0x8] sm:$0xff]  }
 0x972   :  { %v1027_v21 = vmul.f32 %v2770_v16, %v3238_v28  ;;  %v2694_v28 = vld [vmem:[#allocation6 + $0x8] sm:$0xff]   ;;  %2539 = vmatpush3.bf16.msra.mxu0 %v2693_v25 }
 0x973   :  { %2547 = vmatpush3.bf16.msra.mxu1 %v2694_v28  ;;  %2552 = vmatprep.subr.bf16.mxu0 %v2970_v0 }
 0x974   :  { %2560 = vmatprep.subr.bf16.mxu1 %v2970_v0 }
 0x9d4   :  { %v941_v15 = vpop.permute.xlu0 %940 }
 0x9d5   :  { %v943_v10 = vmul.f32 %v2768_v13, %v941_v15  ;;  %v1030_v17 = vpop.permute.xlu1 %1029 }
 0x9d6   :  { %v1032_v18 = vmul.f32 %v2770_v16, %v1030_v17 }
 0x9d7   :  { %945 = vrot.lane.b32.xlu0 %v943_v10, %s2972_s19 }
 0x9d8   :  { %1034 = vrot.lane.b32.xlu1 %v1032_v18, %s2972_s19 }
 0xa49   :  { %v946_v20 = vpop.permute.xlu0 %945 }
 0xa4a   :  { %v3285_v22 = vadd.f32 %v946_v20, %v938_v19  ;;  %v1035_v23 = vpop.permute.xlu1 %1034 }
 0xa4b   :  { %v3287_v24 = vadd.f32 %v1035_v23, %v1027_v21  ;;  %v2697_v21 = vld [vmem:[%s3603_s7] sm:$0xff]   ;;  %v2699_v23 = vld [vmem:[#allocation6] sm:$0xff]  }
 0xa4c   :  { %2771 = vtanh.f32 %v3285_v22 }
 0xa4d   :  { %2773 = vtanh.f32 %v3287_v24 }
 0xa56   :  { %v2772_v29 = vpop.eup %2771 }
 0xa57   :  { %v2774_v31 = vpop.eup %2773  ;;  %951 = vrot.lane.b32.xlu0 %v2772_v29, %s2972_s19 }
 0xa58   :  { %1040 = vrot.lane.b32.xlu1 %v2774_v31, %s2972_s19 }
 0xac9   :  { %v952_v34 = vpop.permute.xlu0 %951 }
 0xaca   :  { %v3303_v33 = vmul.f32 %v2768_v13, %v952_v34  ;;  %v1041_v30 = vpop.permute.xlu1 %1040 }
 0xacb   :  { %v1043_v35 = vmul.f32 %v2770_v16, %v1041_v30 }
 0xacc   :  { %v955_v36 = vpack.c.bf16 %v3303_v33, %v3303_v33 }
 0xacd   :  { %v1044_v37 = vpack.c.bf16 %v1043_v35, %v1043_v35  ;;  %v2700_v35 = vld [vmem:[%s3600_s4] sm:$0xff]  }
 0xace   :  { %1054 = vrot.lane.b32.xlu0 %v955_v36, %s2967_s27 }
 0xacf   :  { %1112 = vrot.lane.b32.xlu1 %v1044_v37, %s2967_s27  ;;  %v2702_v37 = vld [vmem:[%s3600_s4 + $0x8] sm:$0xff]  }
 0xb40   :  { %v1055_v39 = vpop.permute.xlu0 %1054 }
 0xb41   :  { %v1113_v40 = vpop.permute.xlu1 %1112  ;;  %2541 = vmatmul.mubr.msk.bf16.vlgmr.msra.gmra.mrb[24].mxu0 %vm72_vm2, %v1055_v39 }
 0xb42   :  { %2549 = vmatmul.mubr.msk.bf16.vlgmr.msra.gmra.mrb[24].mxu1 %vm72_vm2, %v1113_v40  ;;  %2553 = vmatpush3.bf16.msra.mxu0 %v2695_v38 }
 0xb43   :  { %2554 = vmatprep.subr.bf16.mxu0 %v2970_v0  ;;  %2556 = vmatprep.mubr.msk.bf16.mxu0 %vm2971_vm0, %v2970_v0 }
 0xb44   :  { %2564 = vmatprep.mubr.msk.bf16.mxu1 %vm2971_vm0, %v2970_v0  ;;  %2561 = vmatpush3.bf16.msra.mxu1 %v2697_v21 }
 0xb45   :  { %2562 = vmatprep.subr.bf16.mxu1 %v2970_v0 }
 0xb46   :  { %2555 = vmatpush3.bf16.msra.mxu0 %v2696_v41 }
 0xb47   :  { %2568 = vmatprep.subr.bf16.mxu0 %v2970_v0 }
 0xb49   :  { %2557 = vmatmul.mubr.msk.bf16.vlgmr.msra.gmra.mrb[28].mxu0 %vm72_vm2, %v1113_v40 }
 0xb4a   :  { %2572 = vmatprep.mubr.msk.bf16.mxu0 %vm2971_vm0, %v2970_v0  ;;  %2569 = vmatpush3.bf16.msra.mxu0 %v2699_v23 }
 0xb4b   :  { %2570 = vmatprep.subr.bf16.mxu0 %v2970_v0 }
 0xb4e   :  { %2571 = vmatpush3.bf16.msra.mxu0 %v2701_v27 }
 0xb4f   :  { %2584 = vmatprep.subr.bf16.mxu0 %v2970_v0 }
 0xc14   :  { %v1105_v42 = vpop.f32.mrb[24].mxu0 }
 0xc15   :  { %v1163_v44 = vpop.f32.mrb[24].mxu1  ;;  %v2542_v45 = vpop.f32.mrb[25].mxu0 }
 0xc16   :  { %v1164_v46 = vadd.f32 %v1163_v44, %v1105_v42  ;;  %v2550_v47 = vpop.f32.mrb[25].mxu1  ;;  %v1108_v52 = vpop.f32.mrb[26].mxu0 }
 0xc17   :  { %v1166_v53 = vpop.f32.mrb[26].mxu1  ;;  %v2543_v54 = vpop.f32.mrb[27].mxu0  ;;  %v189_v47 = vadd.f32 %v3107_v14, %v3159_v51 }
 0xc18   :  { %v1176_v55 = vadd.f32 %v3176_v60, %v1164_v46  ;;  %v2551_v56 = vpop.f32.mrb[27].mxu1 }
 0xc1a   :  { %2775 = vtanh.f32 %v1176_v55  ;;  %v2320_v3 = vmul.f32 -1.442695, %v1176_v55 }
 0xc1c   :  { %v1259_v58 = vpop.f32.mrb[28].mxu0 }
 0xc1d   :  { %v1265_v59 = vadd.f32 %v1259_v58, %v186_v57  ;;  %v2558_v61 = vpop.f32.mrb[29].mxu0 }
 0xc1e   :  { %v1262_v62 = vpop.f32.mrb[30].mxu0 }
 0xc1f   :  { %2777 = vtanh.f32 %v1265_v59  ;;  %v2559_v63 = vpop.f32.mrb[31].mxu0  ;;  %v2324_v4 = vmul.f32 -1.442695, %v1265_v59 }
 0xc20   :  { %2779 = vpow2.f32 %v2320_v3 }
 0xc21   :  { %2781 = vpow2.f32 %v2324_v4 }
 0xc24   :  { %v2776_v1 = vpop.eup %2775 }
 0xc25   :  { %1186 = vrot.lane.b32.xlu0 %v2776_v1, %s2972_s19 }
 0xc29   :  { %v2778_v2 = vpop.eup %2777 }
 0xc2a   :  { %1275 = vrot.lane.b32.xlu1 %v2778_v2, %s2972_s19  ;;  %v2780_v5 = vpop.eup %2779 }
 0xc2b   :  { %v1180_v12 = vadd.f32 1.0, %v2780_v5  ;;  %v2782_v6 = vpop.eup %2781 }
 0xc2c   :  { %v1269_v49 = vadd.f32 1.0, %v2782_v6 }
 0xc2d   :  { %2783 = vrcp.f32 %v1180_v12 }
 0xc2e   :  { %2785 = vrcp.f32 %v1269_v49 }
 0xc37   :  { %v2784_v7 = vpop.eup %2783 }
 0xc38   :  { %v2786_v11 = vpop.eup %2785  ;;  %v1184_v16 = vmul.f32 %v2784_v7, %v3285_v22  ;;  %v2698_v22 = vld [vmem:[%s3603_s7 + $0x8] sm:$0xff]  }
 0xc39   :  { %v1273_v18 = vmul.f32 %v2786_v11, %v3287_v24  ;;  %2563 = vmatpush3.bf16.msra.mxu1 %v2698_v22 }
 0xc3a   :  { %2576 = vmatprep.subr.bf16.mxu1 %v2970_v0 }
 0xc97   :  { %v1187_v8 = vpop.permute.xlu0 %1186 }
 0xc98   :  { %v1189_v9 = vmul.f32 %v2784_v7, %v1187_v8 }
 0xc9a   :  { %1191 = vrot.lane.b32.xlu0 %v1189_v9, %s2972_s19 }
 0xc9c   :  { %v1276_v13 = vpop.permute.xlu1 %1275 }
 0xc9d   :  { %v1278_v15 = vmul.f32 %v2786_v11, %v1276_v13 }
 0xc9f   :  { %1280 = vrot.lane.b32.xlu1 %v1278_v15, %s2972_s19 }
 0xd0c   :  { %v1192_v10 = vpop.permute.xlu0 %1191 }
 0xd0d   :  { %v3334_v17 = vadd.f32 %v1192_v10, %v1184_v16  ;;  %v2703_v10 = vld [vmem:[%s3603_s7] sm:$0xff]  }
 0xd0f   :  { %2787 = vtanh.f32 %v3334_v17 }
 0xd11   :  { %v1281_v19 = vpop.permute.xlu1 %1280 }
 0xd12   :  { %v3338_v20 = vadd.f32 %v1281_v19, %v1273_v18  ;;  %v2704_v18 = vld [vmem:[#allocation6] sm:$0xff]   ;;  %v2706_v19 = vld [vmem:[#allocation6 + $0x8] sm:$0xff]  }
 0xd14   :  { %2789 = vtanh.f32 %v3338_v20 }
 0xd19   :  { %v2788_v26 = vpop.eup %2787 }
 0xd1a   :  { %1197 = vrot.lane.b32.xlu0 %v2788_v26, %s2972_s19 }
 0xd1e   :  { %v2790_v24 = vpop.eup %2789 }
 0xd1f   :  { %1286 = vrot.lane.b32.xlu1 %v2790_v24, %s2972_s19 }
 0xd8c   :  { %v1198_v25 = vpop.permute.xlu0 %1197 }
 0xd8d   :  { %v3353_v28 = vmul.f32 %v2784_v7, %v1198_v25 }
 0xd8f   :  { %v1201_v29 = vpack.c.bf16 %v3353_v28, %v3353_v28 }
 0xd91   :  { %1300 = vrot.lane.b32.xlu0 %v1201_v29, %s2967_s27  ;;  %v1287_v31 = vpop.permute.xlu1 %1286  ;;  %v2707_v29 = vld [vmem:[%s3600_s4] sm:$0xff]  }
 0xd92   :  { %v1289_v34 = vmul.f32 %v2786_v11, %v1287_v31 }
 0xd94   :  { %v1290_v30 = vpack.c.bf16 %v1289_v34, %v1289_v34 }
 0xd96   :  { %1358 = vrot.lane.b32.xlu1 %v1290_v30, %s2967_s27  ;;  %v2708_v30 = vld [vmem:[%s3600_s4 + $0x8] sm:$0xff]  }
 0xe03   :  { %v1301_v36 = vpop.permute.xlu0 %1300 }
 0xe04   :  { %2565 = vmatmul.mubr.msk.bf16.vlgmr.msra.gmra.mrb[28].mxu1 %vm72_vm2, %v1301_v36 }
 0xe05   :  { %2577 = vmatpush3.bf16.msra.mxu1 %v2700_v35  ;;  %2580 = vmatprep.mubr.msk.bf16.mxu1 %vm2971_vm0, %v2970_v0 }
 0xe06   :  { %2578 = vmatprep.subr.bf16.mxu1 %v2970_v0 }
 0xe08   :  { %v1359_v38 = vpop.permute.xlu1 %1358 }
 0xe09   :  { %2579 = vmatpush3.bf16.msra.mxu1 %v2702_v37  ;;  %2573 = vmatmul.mubr.msk.bf16.vlgmr.msra.gmra.mrb[32].mxu0 %vm72_vm2, %v1359_v38 }
 0xe0a   :  { %2592 = vmatprep.subr.bf16.mxu1 %v2970_v0  ;;  %2588 = vmatprep.mubr.msk.bf16.mxu0 %vm2971_vm0, %v2970_v0 }
 0xe0b   :  { %2585 = vmatpush3.bf16.msra.mxu0 %v2703_v10  ;;  %v2713_v10 = vld [vmem:[#allocation6 + $0x8] sm:$0xff]  }
 0xe0c   :  { %2581 = vmatmul.mubr.msk.bf16.vlgmr.msra.gmra.mrb[32].mxu1 %vm72_vm2, %v1359_v38  ;;  %2586 = vmatprep.subr.bf16.mxu0 %v2970_v0 }
 0xe0d   :  { %2596 = vmatprep.mubr.msk.bf16.mxu1 %vm2971_vm0, %v2970_v0  ;;  %2593 = vmatpush3.bf16.msra.mxu1 %v2704_v18 }
 0xe0e   :  { %2594 = vmatprep.subr.bf16.mxu1 %v2970_v0 }
 0xe11   :  { %2595 = vmatpush3.bf16.msra.mxu1 %v2706_v19 }
 0xe12   :  { %2608 = vmatprep.subr.bf16.mxu1 %v2970_v0 }
 0xed7   :  { %v1351_v39 = vpop.f32.mrb[28].mxu1 }
 0xed8   :  { %v2566_v40 = vpop.f32.mrb[29].mxu1 }
 0xed9   :  { %v1354_v41 = vpop.f32.mrb[30].mxu1 }
 0xeda   :  { %v2567_v42 = vpop.f32.mrb[31].mxu1 }
 0xedc   :  { %v1409_v44 = vpop.f32.mrb[32].mxu0 }
 0xedd   :  { %v1410_v45 = vadd.f32 %v1409_v44, %v1351_v39  ;;  %v2574_v46 = vpop.f32.mrb[33].mxu0 }
 0xede   :  { %v1412_v52 = vpop.f32.mrb[34].mxu0  ;;  %v3430_v46 = vld [vmem:[%s3601_s5] ss:$0 sm:$0xff] }
 0xedf   :  { %v1422_v53 = vadd.f32 %v3176_v60, %v1410_v45  ;;  %v1505_v54 = vpop.f32.mrb[32].mxu1  ;;  %v2575_v55 = vpop.f32.mrb[35].mxu0 }
 0xee0   :  { %v1511_v56 = vadd.f32 %v1505_v54, %v189_v47  ;;  %v2582_v57 = vpop.f32.mrb[33].mxu1  ;;  %v194_v47 = vadd.f32 %v3430_v46, %v3153_v48 }
 0xee1   :  { %2791 = vtanh.f32 %v1422_v53  ;;  %v1508_v58 = vpop.f32.mrb[34].mxu1  ;;  %v2332_v63 = vmul.f32 -1.442695, %v1422_v53 }
 0xee2   :  { %2793 = vtanh.f32 %v1511_v56  ;;  %v2583_v59 = vpop.f32.mrb[35].mxu1  ;;  %v2336_v1 = vmul.f32 -1.442695, %v1511_v56 }
 0xee3   :  { %2795 = vpow2.f32 %v2332_v63 }
 0xee4   :  { %2797 = vpow2.f32 %v2336_v1 }
 0xeeb   :  { %v2792_v61 = vpop.eup %2791 }
 0xeec   :  { %v2794_v62 = vpop.eup %2793  ;;  %1432 = vrot.lane.b32.xlu0 %v2792_v61, %s2972_s19 }
 0xeed   :  { %1521 = vrot.lane.b32.xlu1 %v2794_v62, %s2972_s19  ;;  %v2796_v14 = vpop.eup %2795 }
 0xeee   :  { %v2798_v51 = vpop.eup %2797  ;;  %v1426_v2 = vadd.f32 1.0, %v2796_v14 }
 0xeef   :  { %v1515_v3 = vadd.f32 1.0, %v2798_v51 }
 0xef0   :  { %2799 = vrcp.f32 %v1426_v2 }
 0xef1   :  { %2801 = vrcp.f32 %v1515_v3 }
 0xefa   :  { %v2800_v4 = vpop.eup %2799 }
 0xefb   :  { %v2802_v12 = vpop.eup %2801  ;;  %v1430_v8 = vmul.f32 %v2800_v4, %v3334_v17  ;;  %v2705_v17 = vld [vmem:[%s3603_s7 + $0x8] sm:$0xff]  }
 0xefc   :  { %v1519_v11 = vmul.f32 %v2802_v12, %v3338_v20  ;;  %2587 = vmatpush3.bf16.msra.mxu0 %v2705_v17 }
 0xefd   :  { %2600 = vmatprep.subr.bf16.mxu0 %v2970_v0 }
 0xf5e   :  { %v1433_v5 = vpop.permute.xlu0 %1432 }
 0xf5f   :  { %v1435_v6 = vmul.f32 %v2800_v4, %v1433_v5  ;;  %v1522_v49 = vpop.permute.xlu1 %1521 }
 0xf60   :  { %v1524_v7 = vmul.f32 %v2802_v12, %v1522_v49 }
 0xf61   :  { %1437 = vrot.lane.b32.xlu0 %v1435_v6, %s2972_s19 }
 0xf62   :  { %1526 = vrot.lane.b32.xlu1 %v1524_v7, %s2972_s19 }
 0xfd3   :  { %v1438_v9 = vpop.permute.xlu0 %1437 }
 0xfd4   :  { %v3385_v13 = vadd.f32 %v1438_v9, %v1430_v8  ;;  %v1527_v15 = vpop.permute.xlu1 %1526  ;;  %v2709_v9 = vld [vmem:[%s3603_s7] sm:$0xff]  }
 0xfd5   :  { %v3387_v16 = vadd.f32 %v1527_v15, %v1519_v11  ;;  %v2711_v11 = vld [vmem:[#allocation6] sm:$0xff]  }
 0xfd6   :  { %2803 = vtanh.f32 %v3385_v13 }
 0xfd7   :  { %2805 = vtanh.f32 %v3387_v16 }
 0xfe0   :  { %v2804_v20 = vpop.eup %2803 }
 0xfe1   :  { %v2806_v21 = vpop.eup %2805  ;;  %1443 = vrot.lane.b32.xlu0 %v2804_v20, %s2972_s19 }
 0xfe2   :  { %1532 = vrot.lane.b32.xlu1 %v2806_v21, %s2972_s19 }
0x1053   :  { %v1444_v23 = vpop.permute.xlu0 %1443 }
0x1054   :  { %v3403_v22 = vmul.f32 %v2800_v4, %v1444_v23  ;;  %v1533_v26 = vpop.permute.xlu1 %1532 }
0x1055   :  { %v1535_v24 = vmul.f32 %v2802_v12, %v1533_v26  ;;  %v2712_v26 = vld [vmem:[%s3600_s4] sm:$0xff]  }
0x1056   :  { %v1447_v27 = vpack.c.bf16 %v3403_v22, %v3403_v22 }
0x1057   :  { %v1536_v25 = vpack.c.bf16 %v1535_v24, %v1535_v24 }
0x1058   :  { %1546 = vrot.lane.b32.xlu0 %v1447_v27, %s2967_s27  ;;  %v2714_v27 = vld [vmem:[%s3600_s4 + $0x8] sm:$0xff]  }
0x1059   :  { %1604 = vrot.lane.b32.xlu1 %v1536_v25, %s2967_s27 }
0x10ca   :  { %v1547_v31 = vpop.permute.xlu0 %1546 }
0x10cb   :  { %v1605_v34 = vpop.permute.xlu1 %1604  ;;  %2589 = vmatmul.mubr.msk.bf16.vlgmr.msra.gmra.mrb[36].mxu0 %vm72_vm2, %v1547_v31 }
0x10cc   :  { %2597 = vmatmul.mubr.msk.bf16.vlgmr.msra.gmra.mrb[36].mxu1 %vm72_vm2, %v1605_v34  ;;  %2601 = vmatpush3.bf16.msra.mxu0 %v2707_v29 }
0x10cd   :  { %2602 = vmatprep.subr.bf16.mxu0 %v2970_v0  ;;  %2604 = vmatprep.mubr.msk.bf16.mxu0 %vm2971_vm0, %v2970_v0 }
0x10ce   :  { %2612 = vmatprep.mubr.msk.bf16.mxu1 %vm2971_vm0, %v2970_v0  ;;  %2609 = vmatpush3.bf16.msra.mxu1 %v2709_v9 }
0x10cf   :  { %2610 = vmatprep.subr.bf16.mxu1 %v2970_v0 }
0x10d0   :  { %2603 = vmatpush3.bf16.msra.mxu0 %v2708_v30 }
0x10d1   :  { %2616 = vmatprep.subr.bf16.mxu0 %v2970_v0 }
0x10d3   :  { %2605 = vmatmul.mubr.msk.bf16.vlgmr.msra.gmra.mrb[40].mxu0 %vm72_vm2, %v1605_v34 }
0x10d4   :  { %2620 = vmatprep.mubr.msk.bf16.mxu0 %vm2971_vm0, %v2970_v0  ;;  %2617 = vmatpush3.bf16.msra.mxu0 %v2711_v11 }
0x10d5   :  { %2618 = vmatprep.subr.bf16.mxu0 %v2970_v0 }
0x10d8   :  { %2619 = vmatpush3.bf16.msra.mxu0 %v2713_v10 }
0x10d9   :  { %2632 = vmatprep.subr.bf16.mxu0 %v2970_v0 }
0x119e   :  { %v1597_v35 = vpop.f32.mrb[36].mxu0 }
0x119f   :  { %v1655_v36 = vpop.f32.mrb[36].mxu1  ;;  %v2590_v37 = vpop.f32.mrb[37].mxu0 }
0x11a0   :  { %v1656_v38 = vadd.f32 %v1655_v36, %v1597_v35  ;;  %v2598_v39 = vpop.f32.mrb[37].mxu1  ;;  %v1600_v40 = vpop.f32.mrb[38].mxu0  ;;  %v3484_v36 = vld [vmem:[%s3604_s8] ss:$0 sm:$0xff] }
0x11a1   :  { %v1658_v41 = vpop.f32.mrb[38].mxu1  ;;  %v2591_v42 = vpop.f32.mrb[39].mxu0  ;;  %v197_v39 = vadd.f32 %v3430_v46, %v3157_v50 }
0x11a2   :  { %v1668_v44 = vadd.f32 %v3176_v60, %v1656_v38  ;;  %v2599_v45 = vpop.f32.mrb[39].mxu1 }
0x11a4   :  { %2807 = vtanh.f32 %v1668_v44  ;;  %v2344_v58 = vmul.f32 -1.442695, %v1668_v44 }
0x11a6   :  { %v1751_v52 = vpop.f32.mrb[40].mxu0 }
0x11a7   :  { %v1757_v53 = vadd.f32 %v1751_v52, %v194_v47  ;;  %v2606_v54 = vpop.f32.mrb[41].mxu0 }
0x11a8   :  { %v1754_v55 = vpop.f32.mrb[42].mxu0 }
0x11a9   :  { %2809 = vtanh.f32 %v1757_v53  ;;  %v2607_v56 = vpop.f32.mrb[43].mxu0  ;;  %v2348_v59 = vmul.f32 -1.442695, %v1757_v53 }
0x11aa   :  { %2811 = vpow2.f32 %v2344_v58 }
0x11ab   :  { %2813 = vpow2.f32 %v2348_v59 }
0x11ae   :  { %v2808_v57 = vpop.eup %2807 }
0x11af   :  { %1678 = vrot.lane.b32.xlu0 %v2808_v57, %s2972_s19 }
0x11b3   :  { %v2810_v60 = vpop.eup %2809 }
0x11b4   :  { %1767 = vrot.lane.b32.xlu1 %v2810_v60, %s2972_s19  ;;  %v2812_v61 = vpop.eup %2811 }
0x11b5   :  { %v1672_v62 = vadd.f32 1.0, %v2812_v61  ;;  %v2814_v63 = vpop.eup %2813 }
0x11b6   :  { %v1761_v48 = vadd.f32 1.0, %v2814_v63 }
0x11b7   :  { %2815 = vrcp.f32 %v1672_v62 }
0x11b8   :  { %2817 = vrcp.f32 %v1761_v48 }
0x11c1   :  { %v2816_v1 = vpop.eup %2815 }
0x11c2   :  { %v2818_v2 = vpop.eup %2817  ;;  %v1676_v5 = vmul.f32 %v2816_v1, %v3385_v13  ;;  %v2710_v13 = vld [vmem:[%s3603_s7 + $0x8] sm:$0xff]  }
0x11c3   :  { %v1765_v49 = vmul.f32 %v2818_v2, %v3387_v16  ;;  %2611 = vmatpush3.bf16.msra.mxu1 %v2710_v13 }
0x11c4   :  { %2624 = vmatprep.subr.bf16.mxu1 %v2970_v0 }
0x1221   :  { %v1679_v14 = vpop.permute.xlu0 %1678 }
0x1222   :  { %v1681_v51 = vmul.f32 %v2816_v1, %v1679_v14 }
0x1224   :  { %1683 = vrot.lane.b32.xlu0 %v1681_v51, %s2972_s19 }
0x1226   :  { %v1768_v3 = vpop.permute.xlu1 %1767 }
0x1227   :  { %v1770_v4 = vmul.f32 %v2818_v2, %v1768_v3 }
0x1229   :  { %1772 = vrot.lane.b32.xlu1 %v1770_v4, %s2972_s19 }
0x1296   :  { %v1684_v12 = vpop.permute.xlu0 %1683 }
0x1297   :  { %v3439_v6 = vadd.f32 %v1684_v12, %v1676_v5  ;;  %v2715_v12 = vld [vmem:[%s3603_s7] sm:$0xff]  }
0x1299   :  { %2819 = vtanh.f32 %v3439_v6 }
0x129b   :  { %v1773_v7 = vpop.permute.xlu1 %1772 }
0x129c   :  { %v3443_v8 = vadd.f32 %v1773_v7, %v1765_v49  ;;  %v2716_v49 = vld [vmem:[#allocation6] sm:$0xff]   ;;  %v2718_v7 = vld [vmem:[#allocation6 + $0x8] sm:$0xff]  }
0x129e   :  { %2821 = vtanh.f32 %v3443_v8 }
0x12a3   :  { %v2820_v15 = vpop.eup %2819 }
0x12a4   :  { %1689 = vrot.lane.b32.xlu0 %v2820_v15, %s2972_s19 }
0x12a8   :  { %v2822_v16 = vpop.eup %2821 }
0x12a9   :  { %1778 = vrot.lane.b32.xlu1 %v2822_v16, %s2972_s19 }
0x1316   :  { %v1690_v18 = vpop.permute.xlu0 %1689 }
0x1317   :  { %v3458_v17 = vmul.f32 %v2816_v1, %v1690_v18 }
0x1319   :  { %v1693_v19 = vpack.c.bf16 %v3458_v17, %v3458_v17 }
0x131b   :  { %1792 = vrot.lane.b32.xlu0 %v1693_v19, %s2967_s27  ;;  %v1779_v20 = vpop.permute.xlu1 %1778 }
0x131c   :  { %v1781_v21 = vmul.f32 %v2818_v2, %v1779_v20 }
0x131e   :  { %v1782_v23 = vpack.c.bf16 %v1781_v21, %v1781_v21 }
0x1320   :  { %1850 = vrot.lane.b32.xlu1 %v1782_v23, %s2967_s27 }
0x138d   :  { %v1793_v24 = vpop.permute.xlu0 %1792 }
0x138e   :  { %2613 = vmatmul.mubr.msk.bf16.vlgmr.msra.gmra.mrb[40].mxu1 %vm72_vm2, %v1793_v24 }
0x138f   :  { %2625 = vmatpush3.bf16.msra.mxu1 %v2712_v26  ;;  %2628 = vmatprep.mubr.msk.bf16.mxu1 %vm2971_vm0, %v2970_v0 }
0x1390   :  { %2626 = vmatprep.subr.bf16.mxu1 %v2970_v0 }
0x1392   :  { %v1851_v25 = vpop.permute.xlu1 %1850 }
0x1393   :  { %2627 = vmatpush3.bf16.msra.mxu1 %v2714_v27  ;;  %2621 = vmatmul.mubr.msk.bf16.vlgmr.msra.gmra.mrb[44].mxu0 %vm72_vm2, %v1851_v25 }
0x1394   :  { %2640 = vmatprep.subr.bf16.mxu1 %v2970_v0  ;;  %2636 = vmatprep.mubr.msk.bf16.mxu0 %vm2971_vm0, %v2970_v0 }
0x1395   :  { %2633 = vmatpush3.bf16.msra.mxu0 %v2715_v12 }
0x1396   :  { %2629 = vmatmul.mubr.msk.bf16.vlgmr.msra.gmra.mrb[44].mxu1 %vm72_vm2, %v1851_v25  ;;  %2634 = vmatprep.subr.bf16.mxu0 %v2970_v0 }
0x1397   :  { %2644 = vmatprep.mubr.msk.bf16.mxu1 %vm2971_vm0, %v2970_v0  ;;  %2641 = vmatpush3.bf16.msra.mxu1 %v2716_v49 }
0x1398   :  { %2642 = vmatprep.subr.bf16.mxu1 %v2970_v0 }
0x139b   :  { %2643 = vmatpush3.bf16.msra.mxu1 %v2718_v7 }
0x1461   :  { %v1843_v29 = vpop.f32.mrb[40].mxu1 }
0x1462   :  { %v2614_v31 = vpop.f32.mrb[41].mxu1 }
0x1463   :  { %v1846_v34 = vpop.f32.mrb[42].mxu1 }
0x1464   :  { %v2615_v30 = vpop.f32.mrb[43].mxu1 }
0x1466   :  { %v1901_v35 = vpop.f32.mrb[44].mxu0 }
0x1467   :  { %v1902_v37 = vadd.f32 %v1901_v35, %v1843_v29  ;;  %v2622_v38 = vpop.f32.mrb[45].mxu0 }
0x1468   :  { %v1904_v40 = vpop.f32.mrb[46].mxu0 }
0x1469   :  { %v1914_v41 = vadd.f32 %v3484_v36, %v1902_v37  ;;  %v1997_v42 = vpop.f32.mrb[44].mxu1  ;;  %v2623_v44 = vpop.f32.mrb[47].mxu0 }
0x146a   :  { %v2003_v45 = vadd.f32 %v1997_v42, %v197_v39  ;;  %v2630_v47 = vpop.f32.mrb[45].mxu1 }
0x146b   :  { %2823 = vtanh.f32 %v1914_v41  ;;  %v2000_v52 = vpop.f32.mrb[46].mxu1  ;;  %v2356_v56 = vmul.f32 -1.442695, %v1914_v41 }
0x146c   :  { %2825 = vtanh.f32 %v2003_v45  ;;  %v2631_v53 = vpop.f32.mrb[47].mxu1  ;;  %v2360_v57 = vmul.f32 -1.442695, %v2003_v45 }
0x146d   :  { %2827 = vpow2.f32 %v2356_v56 }
0x146e   :  { %2829 = vpow2.f32 %v2360_v57 }
0x1475   :  { %v2824_v54 = vpop.eup %2823 }
0x1476   :  { %v2826_v55 = vpop.eup %2825  ;;  %1924 = vrot.lane.b32.xlu0 %v2824_v54, %s2972_s19 }
0x1477   :  { %2013 = vrot.lane.b32.xlu1 %v2826_v55, %s2972_s19  ;;  %v2828_v50 = vpop.eup %2827 }
0x1478   :  { %v2830_v46 = vpop.eup %2829  ;;  %v1918_v60 = vadd.f32 1.0, %v2828_v50 }
0x1479   :  { %v2007_v58 = vadd.f32 1.0, %v2830_v46 }
0x147a   :  { %2831 = vrcp.f32 %v1918_v60 }
0x147b   :  { %2833 = vrcp.f32 %v2007_v58 }
0x1484   :  { %v2832_v59 = vpop.eup %2831 }
0x1485   :  { %v2834_v62 = vpop.eup %2833  ;;  %v1922_v14 = vmul.f32 %v2832_v59, %v3439_v6  ;;  %v2717_v6 = vld [vmem:[%s3603_s7 + $0x8] sm:$0xff]   ;;  %s2973_s7 = smov 96  }
0x1486   :  { %v2011_v2 = vmul.f32 %v2834_v62, %v3443_v8  ;;  %2635 = vmatpush3.bf16.msra.mxu0 %v2717_v6 }
0x14e8   :  { %v1925_v61 = vpop.permute.xlu0 %1924 }
0x14e9   :  { %v1927_v63 = vmul.f32 %v2832_v59, %v1925_v61  ;;  %v2014_v48 = vpop.permute.xlu1 %2013 }
0x14ea   :  { %v2016_v1 = vmul.f32 %v2834_v62, %v2014_v48 }
0x14eb   :  { %1929 = vrot.lane.b32.xlu0 %v1927_v63, %s2972_s19 }
0x14ec   :  { %2018 = vrot.lane.b32.xlu1 %v2016_v1, %s2972_s19 }
0x155d   :  { %v1930_v51 = vpop.permute.xlu0 %1929 }
0x155e   :  { %v1932_v3 = vadd.f32 %v1930_v51, %v1922_v14  ;;  %v2019_v4 = vpop.permute.xlu1 %2018 }
0x155f   :  { %v3495_v5 = vadd.f32 %v2019_v4, %v2011_v2 }
0x1560   :  { %2835 = vtanh.f32 %v1932_v3 }
0x1561   :  { %2837 = vtanh.f32 %v3495_v5 }
0x156a   :  { %v2836_v8 = vpop.eup %2835 }
0x156b   :  { %v2838_v9 = vpop.eup %2837  ;;  %1935 = vrot.lane.b32.xlu0 %v2836_v8, %s2972_s19 }
0x156c   :  { %2024 = vrot.lane.b32.xlu1 %v2838_v9, %s2972_s19 }
0x15dd   :  { %v1936_v11 = vpop.permute.xlu0 %1935 }
0x15de   :  { %v1938_v13 = vmul.f32 %v2832_v59, %v1936_v11  ;;  %v2025_v15 = vpop.permute.xlu1 %2024 }
0x15df   :  { %v2027_v16 = vmul.f32 %v2834_v62, %v2025_v15 }
0x15e0   :  { %v1939_v10 = vpack.c.bf16 %v1938_v13, %v1938_v13 }
0x15e1   :  { %v2028_v18 = vpack.c.bf16 %v2027_v16, %v2027_v16 }
0x15e2   :  { %2038 = vrot.lane.b32.xlu0 %v1939_v10, %s2967_s27 }
0x15e3   :  { %2096 = vrot.lane.b32.xlu1 %v2028_v18, %s2967_s27 }
0x1654   :  { %v2039_v19 = vpop.permute.xlu0 %2038 }
0x1655   :  { %v2097_v0 = vpop.permute.xlu1 %2096  ;;  %2637 = vmatmul.mubr.msk.bf16.vlgmr.msra.gmra.mrb[48].mxu0 %vm72_vm2, %v2039_v19 }
0x1656   :  { %2645 = vmatmul.mubr.msk.bf16.vlgmr.msra.gmra.mrb[48].mxu1 %vm72_vm2, %v2097_v0 }
0x1728   :  { %v2089_v20 = vpop.f32.mrb[48].mxu0 }
0x1729   :  { %v2147_v21 = vpop.f32.mrb[48].mxu1  ;;  %v2638_v23 = vpop.f32.mrb[49].mxu0 }
0x172a   :  { %v2148_v26 = vadd.f32 %v2147_v21, %v2089_v20  ;;  %v2646_v24 = vpop.f32.mrb[49].mxu1  ;;  %v2092_v27 = vpop.f32.mrb[50].mxu0 }
0x172b   :  { %v2150_v25 = vpop.f32.mrb[50].mxu1  ;;  %v2639_v29 = vpop.f32.mrb[51].mxu0 }
0x172c   :  { %v2160_v31 = vadd.f32 %v3484_v36, %v2148_v26  ;;  %v2647_v34 = vpop.f32.mrb[51].mxu1 }
0x172e   :  { %2839 = vtanh.f32 %v2160_v31  ;;  %v2368_v35 = vmul.f32 -1.442695, %v2160_v31 }
0x1730   :  { %2841 = vpow2.f32 %v2368_v35 }
0x1738   :  { %v2840_v30 = vpop.eup %2839 }
0x1739   :  { %2170 = vrot.lane.b32.xlu0 %v2840_v30, %s2972_s19 }
0x173a   :  { %v2842_v37 = vpop.eup %2841 }
0x173b   :  { %v2164_v38 = vadd.f32 1.0, %v2842_v37 }
0x173d   :  { %2843 = vrcp.f32 %v2164_v38 }
0x1747   :  { %v2844_v39 = vpop.eup %2843 }
0x1748   :  { %v2168_v36 = vmul.f32 %v2844_v39, %v1932_v3 }
0x17ab   :  { %v2171_v40 = vpop.permute.xlu0 %2170 }
0x17ac   :  { %v2173_v41 = vmul.f32 %v2844_v39, %v2171_v40 }
0x17ae   :  { %2175 = vrot.lane.b32.xlu1 %v2173_v41, %s2972_s19 }
0x17b2   :  { %711 = vrot.lane.b32.xlu1 %v3253_v32, %s2967_s27 }
0x17b6   :  { %1203 = vrot.lane.b32.xlu1 %v3353_v28, %s2967_s27 }
0x17ba   :  { %1695 = vrot.lane.b32.xlu1 %v3458_v17, %s2967_s27 }
0x1820   :  { %v2176_v42 = vpop.permute.xlu1 %2175 }
0x1821   :  { %v2178_v44 = vadd.f32 %v2176_v42, %v2168_v36 }
0x1823   :  { %2845 = vtanh.f32 %v2178_v44 }
0x1824   :  { %v712_v45 = vpop.permute.xlu1 %711 }
0x1825   :  { %715 = vst.msk [vmem:[#allocation8 + $0x8] sm:$0xff] %vm72_vm2, %v712_v45 }
0x1828   :  { %v1204_v47 = vpop.permute.xlu1 %1203 }
0x1829   :  { %1207 = vst.msk [vmem:[#allocation8 + $0x18] sm:$0xff] %vm72_vm2, %v1204_v47 }
0x182c   :  { %v1696_v52 = vpop.permute.xlu1 %1695 }
0x182d   :  { %v2846_v53 = vpop.eup %2845  ;;  %1699 = vst.msk [vmem:[#allocation8 + $0x28] sm:$0xff] %vm72_vm2, %v1696_v52 }
0x182e   :  { %2181 = vrot.lane.b32.xlu0 %v2846_v53, %s2972_s19  ;;  %s2974_s19 = smov [#allocation8]  }
0x182f   :  { %s2219_s23 = sshll.u32 %s2974_s19, 4  ;;  %s2220_s23 = int_to_ptr.vmem [resolvable:$true] %s2219_s23 }
0x1830   :  { %s2892_s24 = scalar_lea.vmem %s2220_s23, 1024  ;;  %p2897_p3 = scmp.lt.s32.totalorder %s2220_s23, %s2220_s23 }
0x1831   :  { %p2893_p2 = scmp.ne.s32.totalorder %s2220_s23, %s2892_s24  ;;  %p2898_p4 = scmp.lt.s32.totalorder %s2892_s24, %s2892_s24 }
0x1832   :  { %466 = vrot.lane.b32.xlu0 %v3203_v43, %s2967_s27 }
0x1833   :  { %p2899_p5 = por %p2898_p4, %p2897_p3 }
0x1835   :  { %p2900_p6 = pnand %p2899_p5, %p2893_p2 }
0x1836   :  { %957 = vrot.lane.b32.xlu0 %v3303_v33, %s2967_s27 }
0x183a   :  { %1449 = vrot.lane.b32.xlu0 %v3403_v22, %s2967_s27 }
0x183e   :  { %1941 = vrot.lane.b32.xlu0 %v1938_v13, %s2967_s27 }
0x1842   :  { %2199 = vrot.lane.b32.xlu0 %v3495_v5, %s2973_s7 }
0x18a0   :  { %v2182_v32 = vpop.permute.xlu0 %2181 }
0x18a1   :  { %v2184_v28 = vmul.f32 %v2844_v39, %v2182_v32 }
0x18a3   :  { %2187 = vrot.lane.b32.xlu1 %v2184_v28, %s2967_s27  ;;  %v2661_v54 = vpack.i.bf16 %v2184_v28, %v2027_v16 }
0x18a4   :  { %v467_v17 = vpop.permute.xlu0 %466 }
0x18a5   :  { %469 = vst.msk [vmem:[#allocation8] sm:$0xff] %vm72_vm2, %v467_v17 }
0x18a7   :  { %2662 = vrot.lane.b32.xlu1 %v2661_v54, %s2967_s27 }
0x18a8   :  { %v958_v43 = vpop.permute.xlu0 %957 }
0x18a9   :  { %961 = vst.msk [vmem:[#allocation8 + $0x10] sm:$0xff] %vm72_vm2, %v958_v43 }
0x18ab   :  { %2210 = vrot.lane.b32.xlu1 %v2178_v44, %s2973_s7 }
0x18ac   :  { %v1450_v33 = vpop.permute.xlu0 %1449 }
0x18ad   :  { %1453 = vst.msk [vmem:[#allocation8 + $0x20] sm:$0xff] %vm72_vm2, %v1450_v33 }
0x18b0   :  { %v1942_v22 = vpop.permute.xlu0 %1941 }
0x18b1   :  { %1945 = vst.msk [vmem:[#allocation8 + $0x30] sm:$0xff] %vm72_vm2, %v1942_v22 }
0x18b4   :  { %v2200_v55 = vpop.permute.xlu0 %2199 }
0x18b5   :  { %2202 = vst.msk [vmem:[#allocation11] sm:$0xff] %vm72_vm2, %v2200_v55 }
0x1915   :  { %v2188_v56 = vpop.permute.xlu1 %2187 }
0x1916   :  { %2191 = vst.msk [vmem:[#allocation8 + $0x38] sm:$0xff] %vm72_vm2, %v2188_v56 }
0x1917   :  { %2903 = shalt.err (!%p2900_p6)
}
0x1918   :  { %s2904_s6 = scalar_lea.hbm %s3605_s9, 1024 }
0x1919   :  { %p2905_p7 = scmp.ne.s32.totalorder %s3605_s9, %s2904_s6  ;;  %p2908_p8 = scmp.lt.u32.totalorder %s2904_s6, %s3605_s9 }
0x191b   :  { %p2910_p9 = pnand %p2908_p8, %p2905_p7 }
0x191d   :  { %2913 = shalt.err (!%p2910_p9)
}
0x191e   :  { %s2975_s29 = smov 128   ;;  %s2976_s30 = smov 8   ;;  %v2663_v57 = vpop.permute.xlu1 %2662 }
0x191f   :  { %2225 = dma.vmem_to_hbm [thread:$0]  %s2220_s23, 1024, %s3605_s9, [#allocation5], %s2975_s29, %s2975_s29, %s2976_s30   ;;  %v2665_v50 = vunpack.i.h.bf16 %v2663_v57  ;;  %v2664_v46 = vunpack.i.l.bf16 %v2663_v57 }
0x1920   :  { %s2977_s13 = smov [#allocation9]   ;;  %s2978_s2 = smov [#allocation11]  }
0x1921   :  { %s2231_s14 = sshll.u32 %s2977_s13, 4  ;;  %s2243_s15 = sshll.u32 %s2978_s2, 4  ;;  %2197 = vst.msk [vmem:[#allocation9] sm:$0xff] %vm72_vm2, %v2664_v46  ;;  %2208 = vst.msk [vmem:[#allocation9 + $0x8] sm:$0xff] %vm72_vm2, %v2665_v50  ;;  %s2232_s14 = int_to_ptr.vmem [resolvable:$true] %s2231_s14  ;;  %s3558_s15 = int_to_ptr.vmem [resolvable:$true] %s2243_s15 }
0x1922   :  { %v2211_v60 = vpop.permute.xlu1 %2210  ;;  %s2914_s16 = scalar_lea.vmem %s2232_s14, 256  ;;  %p2919_p11 = scmp.lt.s32.totalorder %s2232_s14, %s2232_s14 }
0x1923   :  { %p2915_p10 = scmp.ne.s32.totalorder %s2232_s14, %s2914_s16  ;;  %p2920_p12 = scmp.lt.s32.totalorder %s2914_s16, %s2914_s16 }
0x1925   :  { %p2921_p13 = por %p2920_p12, %p2919_p11 }
0x1927   :  { %p2922_p0 = pnand %p2921_p13, %p2915_p10 }
0x1929   :  { %2925 = shalt.err (!%p2922_p0)
}
0x192a   :  { %s2926_s20 = scalar_lea.hbm %s3606_s10, 256 }
0x192b   :  { %p2927_p1 = scmp.ne.s32.totalorder %s3606_s10, %s2926_s20  ;;  %p2930_p2 = scmp.lt.u32.totalorder %s2926_s20, %s3606_s10 }
0x192d   :  { %p2932_p3 = pnand %p2930_p2, %p2927_p1 }
0x192f   :  { %2935 = shalt.err (!%p2932_p3)
}
0x1930   :  { %2237 = dma.vmem_to_hbm [thread:$0]  %s2232_s14, 256, %s3606_s10, [#allocation10], %s2975_s29, %s2975_s29, %s2976_s30   ;;  %2213 = vst.msk [vmem:[#allocation11 + $0x8] sm:$0xff] %vm72_vm2, %v2211_v60 }
0x1931   :  { %s2936_s7 = scalar_lea.vmem %s3558_s15, 256  ;;  %p2941_p5 = scmp.lt.s32.totalorder %s3558_s15, %s3558_s15 }
0x1932   :  { %p2937_p4 = scmp.ne.s32.totalorder %s3558_s15, %s2936_s7  ;;  %p2942_p6 = scmp.lt.s32.totalorder %s2936_s7, %s2936_s7 }
0x1934   :  { %p2943_p7 = por %p2942_p6, %p2941_p5 }
0x1936   :  { %p2944_p8 = pnand %p2943_p7, %p2937_p4 }
0x1938   :  { %2947 = shalt.err (!%p2944_p8)
}
0x1939   :  { %s2948_s24 = scalar_lea.hbm %s3607_s11, 256 }
0x193a   :  { %p2949_p9 = scmp.ne.s32.totalorder %s3607_s11, %s2948_s24  ;;  %p2952_p10 = scmp.lt.u32.totalorder %s2948_s24, %s3607_s11 }
0x193c   :  { %p2954_p11 = pnand %p2952_p10, %p2949_p9 }
0x193e   :  { %2957 = shalt.err (!%p2954_p11)
}
0x193f   :  { %2249 = dma.vmem_to_hbm [thread:$0]  %s3558_s15, 256, %s3607_s11, [#allocation10], %s2975_s29, %s2975_s29, %s2976_s30  }
0x1940   :  { %2962 = dma.done.wait [#allocation5], 1024  }
0x1941   :  { %2963 = vsyncadd [#allocation5], 4294966272 }
0x1942   :  { %2964 = dma.done.wait [#allocation10], 512  }
0x1943   :  { %2965 = vsyncadd [#allocation10], 4294966784 }
0x1944   :  { %2259 = vsyncpa [#allocation4], 1 }
0x1945   :  { %2260 = vsyncpa [#allocation7], 1 }
0x1946   :  { %2261 = vsyncpa [#allocation5], 1 }
0x1947   :  { %2262 = vsyncpa [#allocation10], 1 }

</bundles_post_ra>
